<compile_context>
chip_gen: v5e
topology: v5e:2x2
jax: 0.10.0
libtpu: 0.0.40
codegen_flags: <defaults>
</compile_context>

<pallas_src>
import functools

import jax
import jax.numpy as jnp
import numpy as np
from jax import lax
from jax.experimental import pallas as pl
from jax.experimental.pallas import tpu as pltpu

LANE = 128


def _round_up(n, m):
    return ((n + m - 1) // m) * m


def gru_recurrence_kernel(gi_ref, h0_ref, whh_ref, bhn_ref, wfc_ref, bfc_ref,
                          out_ref, hout_ref, h_scratch):
    """One (batch-block, time-block) grid step of the GRU recurrence.

    gi_ref : (Tt, Bt, 3*Hp) precomputed input projections (biases b_ih and the
             r/z parts of b_hh already folded in), gate-major 128-aligned.
    h0_ref : (Bt, Hp)   initial hidden state (zero in padded rows/lanes)
    whh_ref: (Hp, 3*Hp) W_hh^T, gate-major 128-aligned, padded rows/cols zero
    bhn_ref: (1, Hp)    b_hn only (must stay inside the r*(...) term)
    wfc_ref: (Hp, Op)   W_fc^T, zero-padded
    bfc_ref: (1, Op)    b_fc, zero-padded
    out_ref: (Bt, Op)   fc(relu(h_T)), written on the last time block
    hout_ref:(Bt, Hp)   h_T, written on the last time block
    h_scratch: VMEM (Bt, Hp) f32 — hidden state carried across time blocks
    """
    t_blk = pl.program_id(1)
    Tt = gi_ref.shape[0]
    Hp = h0_ref.shape[1]

    @pl.when(t_blk == 0)
    def _():
        h_scratch[...] = h0_ref[...].astype(jnp.float32)

    b_hn = bhn_ref[...]                                            # (1, Hp)

    def step(t, h):
        gi_t = gi_ref[t]                                           # (Bt, 3Hp)
        # Only the hidden matmul remains on the serial critical path.
        gh = jnp.dot(h, whh_ref[...], preferred_element_type=jnp.float32)
        # Lane-aligned (128-multiple) static gate slices -> full-vreg VPU ops.
        i_r = gi_t[:, 0:Hp]
        i_z = gi_t[:, Hp:2 * Hp]
        i_n = gi_t[:, 2 * Hp:3 * Hp]
        h_r = gh[:, 0:Hp]
        h_z = gh[:, Hp:2 * Hp]
        h_n = gh[:, 2 * Hp:3 * Hp]
        r = jax.nn.sigmoid(i_r + h_r)
        z = jax.nn.sigmoid(i_z + h_z)
        n = jnp.tanh(i_n + r * (h_n + b_hn))   # b_hn inside r* term (PyTorch)
        return (1.0 - z) * n + z * h

    # Short, capped unroll over the time tile (Tt <= 8).
    h = lax.fori_loop(0, Tt, step, h_scratch[...], unroll=True)
    h_scratch[...] = h

    @pl.when(t_blk == pl.num_programs(1) - 1)
    def _():
        hout_ref[...] = h.astype(hout_ref.dtype)
        relu_h = jnp.maximum(h, 0.0)
        out_ref[...] = (jnp.dot(relu_h, wfc_ref[...],
                                preferred_element_type=jnp.float32)
                        + bfc_ref[...]).astype(out_ref.dtype)


@functools.partial(jax.jit, static_argnames=("H", "O", "t_tile", "b_tile"))
def gru_net_forward(x, h, prep, *, H, O, t_tile=8, b_tile=128):
    """x: (B, T, D) f32; h: (1, B, H) f32. Returns (out (B, O), h_T (1, B, H)).

    b_tile: batch block size (multiple of 8). Default keeps one block (best for
    a single TensorCore); on v7x set it to ~B/2 to use both cores ("parallel"
    batch axis)."""
    B, T, D = x.shape
    Hp = prep["w_hh_t"].shape[0]
    Op = prep["w_fc_t"].shape[1]

    Bt = min(_round_up(B, 8), _round_up(b_tile, 8))
    Bp = _round_up(B, Bt)
    Tt = min(t_tile, T)
    Tp = _round_up(T, Tt)

    # (B,T,D) -> (T,B,D) (D is narrow, cheap), pad batch to full sublanes, then
    # the input projection for ALL timesteps as one matmul (off the serial
    # path).  b_ih + the r/z slices of b_hh are folded into the bias.
    xt = jnp.transpose(x, (1, 0, 2))
    xt = jnp.pad(xt, ((0, 0), (0, Bp - B), (0, 0)))
    gi = (jnp.dot(xt.reshape(T * Bp, D), prep["w_ih_t"],
                  preferred_element_type=jnp.float32)
          + prep["b_gi"]).reshape(T, Bp, 3 * Hp)                    # (T,Bp,3Hp)
    if Tp > T:
        # Pad time with exact identity steps: z pre-activation = +1e9
        # => sigmoid == 1.0 exactly in f32 => h_new == h.
        pad = jnp.zeros((Tp - T, Bp, 3 * Hp), jnp.float32)
        pad = pad.at[:, :, Hp:2 * Hp].set(1e9)
        gi = jnp.concatenate([gi, pad], axis=0)

    h0 = jnp.pad(h[0].astype(jnp.float32), ((0, Bp - B), (0, Hp - H)))

    grid = (Bp // Bt, Tp // Tt)
    out_p, h_p = pl.pallas_call(
        gru_recurrence_kernel,
        out_shape=(jax.ShapeDtypeStruct((Bp, Op), jnp.float32),
                   jax.ShapeDtypeStruct((Bp, Hp), jnp.float32)),
        grid_spec=pltpu.PrefetchScalarGridSpec(
            num_scalar_prefetch=0,
            grid=grid,
            in_specs=[
                pl.BlockSpec((Tt, Bt, 3 * Hp), lambda b, t: (t, b, 0)),  # gi
                pl.BlockSpec((Bt, Hp), lambda b, t: (b, 0)),             # h0
                pl.BlockSpec((Hp, 3 * Hp), lambda b, t: (0, 0)),         # W_hh^T
                pl.BlockSpec((1, Hp), lambda b, t: (0, 0)),              # b_hn
                pl.BlockSpec((Hp, Op), lambda b, t: (0, 0)),             # W_fc^T
                pl.BlockSpec((1, Op), lambda b, t: (0, 0)),              # b_fc
            ],
            out_specs=[
                pl.BlockSpec((Bt, Op), lambda b, t: (b, 0)),
                pl.BlockSpec((Bt, Hp), lambda b, t: (b, 0)),
            ],
            scratch_shapes=[pltpu.VMEM((Bt, Hp), jnp.float32)],
        ),
        compiler_params=pltpu.CompilerParams(
            dimension_semantics=("parallel", "arbitrary"),
            vmem_limit_bytes=32 * 1024 * 1024,
        ),
    )(gi, h0, prep["w_hh_t"], prep["b_hn"], prep["w_fc_t"], prep["b_fc"])

    return out_p[:B, :O], h_p[:B, :H][None]


def prepare_params(params):
    """One-time layout prep (outside jit): transpose to (in, out), pad H/O to
    128-lane multiples, lay the 3H gate axis out gate-major / 128-aligned, and
    fold b_ih + the r/z slices of b_hh into the gi bias.  Padded rows/cols are
    zero so padded hidden lanes stay exactly 0 end-to-end."""
    H = params["w_hh"].shape[1]
    O = params["w_fc"].shape[0]
    Hp = _round_up(H, LANE)
    Op = _round_up(O, LANE)

    def gate_pad_cols(w_t):                        # (rows, 3H) -> (rows, 3Hp)
        rows = w_t.shape[0]
        out = jnp.zeros((rows, 3 * Hp), jnp.float32)
        for g in range(3):
            out = out.at[:, g * Hp:g * Hp + H].set(w_t[:, g * H:(g + 1) * H])
        return out

    w_ih_t = gate_pad_cols(params["w_ih"].T.astype(jnp.float32))         # (D, 3Hp)
    whh_rows = jnp.zeros((Hp, 3 * H), jnp.float32).at[:H].set(
        params["w_hh"].T.astype(jnp.float32))
    w_hh_t = gate_pad_cols(whh_rows)                                     # (Hp, 3Hp)

    b_ih = params["b_ih"].astype(jnp.float32)
    b_hh = params["b_hh"].astype(jnp.float32)
    b_comb = jnp.concatenate(
        [b_ih[:H] + b_hh[:H],            # r: b_ir + b_hr
         b_ih[H:2 * H] + b_hh[H:2 * H],  # z: b_iz + b_hz
         b_ih[2 * H:]],                  # n: b_in only (b_hn stays in-kernel)
        axis=0).reshape(1, 3 * H)
    b_gi = gate_pad_cols(b_comb)                                         # (1, 3Hp)
    b_hn = jnp.zeros((1, Hp), jnp.float32).at[0, :H].set(b_hh[2 * H:])   # (1, Hp)

    w_fc_t = jnp.zeros((Hp, Op), jnp.float32).at[:H, :O].set(
        params["w_fc"].T.astype(jnp.float32))
    b_fc = jnp.zeros((1, Op), jnp.float32).at[:, :O].set(
        params["b_fc"].astype(jnp.float32))

    return {"w_ih_t": w_ih_t, "w_hh_t": w_hh_t, "b_gi": b_gi, "b_hn": b_hn,
            "w_fc_t": w_fc_t, "b_fc": b_fc}


def init_params(key, input_dim, hidden_dim, output_dim):
    """PyTorch-style uniform(-1/sqrt(H), 1/sqrt(H)) init, deterministic."""
    ks = jax.random.split(key, 6)
    k = 1.0 / np.sqrt(hidden_dim)
    u = lambda kk, shape: jax.random.uniform(kk, shape, jnp.float32, -k, k)
    return {
        "w_ih": u(ks[0], (3 * hidden_dim, input_dim)),
        "w_hh": u(ks[1], (3 * hidden_dim, hidden_dim)),
        "b_ih": u(ks[2], (3 * hidden_dim,)),
        "b_hh": u(ks[3], (3 * hidden_dim,)),
        "w_fc": u(ks[4], (output_dim, hidden_dim)),
        "b_fc": u(ks[5], (output_dim,)),
    }


def ref_forward(x, h, params):
    """Pure-JAX reference of the PyTorch GRUNet.forward (eval mode)."""
    B, T, D = x.shape
    H = params["w_hh"].shape[1]
    hs = h[0]
    for t in range(T):
        gi = x[:, t] @ params["w_ih"].T + params["b_ih"]
        gh = hs @ params["w_hh"].T + params["b_hh"]
        i_r, i_z, i_n = gi[:, :H], gi[:, H:2 * H], gi[:, 2 * H:]
        h_r, h_z, h_n = gh[:, :H], gh[:, H:2 * H], gh[:, 2 * H:]
        r = jax.nn.sigmoid(i_r + h_r)
        z = jax.nn.sigmoid(i_z + h_z)
        n = jnp.tanh(i_n + r * h_n)
        hs = (1.0 - z) * n + z * hs
    out = jnp.maximum(hs, 0.0) @ params["w_fc"].T + params["b_fc"]
    return out, hs[None]


if __name__ == "__main__":
    B, T, D, H, O = 2, 8, 16, 32, 8   # batch, seq, input_dim, hidden_dim, output_dim
    key = jax.random.PRNGKey(0)
    kx, kp = jax.random.split(key)

    x = jax.random.normal(kx, (B, T, D), jnp.float32)
    h0 = jnp.zeros((1, B, H), jnp.float32)       # GRUNet.initHidden
    params = init_params(kp, D, H, O)
    prep = prepare_params(params)                # one-time layout prep

    out, h_last = gru_net_forward(x, h0, prep, H=H, O=O)
    jax.block_until_ready((out, h_last))

    out_ref, h_ref = ref_forward(x, h0, params)
    np.testing.assert_allclose(np.asarray(out), np.asarray(out_ref),
                               atol=1e-5, rtol=1e-5)
    np.testing.assert_allclose(np.asarray(h_last), np.asarray(h_ref),
                               atol=1e-5, rtol=1e-5)

    print("KERNEL_OK")
</pallas_src>

<mosaic_0001>
module attributes {stable_mosaic.version = 11 : i64} {
  func.func @gru_recurrence_kernel(%arg0: i32, %arg1: i32, %arg2: memref<8x8x384xf32, #tpu.memory_space<vmem>>, %arg3: memref<8x128xf32, #tpu.memory_space<vmem>>, %arg4: memref<128x384xf32, #tpu.memory_space<vmem>>, %arg5: memref<1x128xf32, #tpu.memory_space<vmem>>, %arg6: memref<128x128xf32, #tpu.memory_space<vmem>>, %arg7: memref<1x128xf32, #tpu.memory_space<vmem>>, %arg8: memref<8x128xf32, #tpu.memory_space<vmem>>, %arg9: memref<8x128xf32, #tpu.memory_space<vmem>>, %arg10: memref<8x128xf32, #tpu.memory_space<vmem>>) attributes {dimension_semantics = [#tpu.dimension_semantics<parallel>, #tpu.dimension_semantics<arbitrary>], iteration_bounds = array<i64: 1, 1>, scalar_prefetch = 0 : i64, scratch_operands = 1 : i64, tpu.core_type = #tpu.core_type<tc>, window_params = [{transform_indices = @transform_0, window_bounds = array<i64: 8, 8, 384>}, {transform_indices = @transform_1, window_bounds = array<i64: 8, 128>}, {pipeline_mode = #tpu.pipeline_mode<synchronous>, transform_indices = @transform_2, window_bounds = array<i64: 128, 384>}, {pipeline_mode = #tpu.pipeline_mode<synchronous>, transform_indices = @transform_3, window_bounds = array<i64: 1, 128>}, {pipeline_mode = #tpu.pipeline_mode<synchronous>, transform_indices = @transform_4, window_bounds = array<i64: 128, 128>}, {pipeline_mode = #tpu.pipeline_mode<synchronous>, transform_indices = @transform_5, window_bounds = array<i64: 1, 128>}, {transform_indices = @transform_6, window_bounds = array<i64: 8, 128>}, {transform_indices = @transform_7, window_bounds = array<i64: 8, 128>}]} {
    %c0_i32 = arith.constant 0 : i32
    %0 = arith.cmpi eq, %arg1, %c0_i32 : i32
    %1 = arith.extui %0 : i1 to i32
    %c0_i32_0 = arith.constant 0 : i32
    %2 = arith.cmpi ne, %1, %c0_i32_0 : i32
    scf.if %2 {
      %c0_72 = arith.constant 0 : index
      %c0_73 = arith.constant 0 : index
      %273 = vector.load %arg3[%c0_72, %c0_73] : memref<8x128xf32, #tpu.memory_space<vmem>>, vector<8x128xf32>
      %c0_74 = arith.constant 0 : index
      %c0_75 = arith.constant 0 : index
      %274 = vector.load %arg10[%c0_74, %c0_75] : memref<8x128xf32, #tpu.memory_space<vmem>>, vector<8x128xf32>
      tpu.vector_store %arg10[%c0_74, %c0_75], %273 {strides = array<i32>} : memref<8x128xf32, #tpu.memory_space<vmem>>, vector<8x128xf32>,
    } else {
    }
    %c0 = arith.constant 0 : index
    %c0_1 = arith.constant 0 : index
    %3 = vector.load %arg5[%c0, %c0_1] : memref<1x128xf32, #tpu.memory_space<vmem>>, vector<1x128xf32>
    %c0_2 = arith.constant 0 : index
    %c0_3 = arith.constant 0 : index
    %4 = vector.load %arg10[%c0_2, %c0_3] : memref<8x128xf32, #tpu.memory_space<vmem>>, vector<8x128xf32>
    %c0_i32_4 = arith.constant 0 : i32
    %5 = arith.index_cast %c0_i32_4 : i32 to index
    %c0_5 = arith.constant 0 : index
    %c0_6 = arith.constant 0 : index
    %6 = vector.load %arg2[%5, %c0_5, %c0_6] : memref<8x8x384xf32, #tpu.memory_space<vmem>>, vector<1x8x384xf32>
    %7 = vector.shape_cast %6 : vector<1x8x384xf32> to vector<8x384xf32>
    %c0_7 = arith.constant 0 : index
    %c0_8 = arith.constant 0 : index
    %8 = vector.load %arg4[%c0_7, %c0_8] : memref<128x384xf32, #tpu.memory_space<vmem>>, vector<128x384xf32>
    %cst = arith.constant dense<0.000000e+00> : vector<8x384xf32>
    %9 = tpu.matmul %4, %8, %cst {dimension_numbers = #tpu.dot_dimension_numbers<[1], [0], [0], [1], [0, 0, 1, 1], [], []>} : vector<8x128xf32>, vector<128x384xf32>, vector<8x384xf32> -> vector<8x384xf32>
    %10 = vector.extract_strided_slice %7 {offsets = [0, 0], sizes = [8, 128], strides = [1, 1]} : vector<8x384xf32> to vector<8x128xf32>
    %11 = vector.extract_strided_slice %7 {offsets = [0, 128], sizes = [8, 128], strides = [1, 1]} : vector<8x384xf32> to vector<8x128xf32>
    %12 = vector.extract_strided_slice %7 {offsets = [0, 256], sizes = [8, 128], strides = [1, 1]} : vector<8x384xf32> to vector<8x128xf32>
    %13 = vector.extract_strided_slice %9 {offsets = [0, 0], sizes = [8, 128], strides = [1, 1]} : vector<8x384xf32> to vector<8x128xf32>
    %14 = vector.extract_strided_slice %9 {offsets = [0, 128], sizes = [8, 128], strides = [1, 1]} : vector<8x384xf32> to vector<8x128xf32>
    %15 = vector.extract_strided_slice %9 {offsets = [0, 256], sizes = [8, 128], strides = [1, 1]} : vector<8x384xf32> to vector<8x128xf32>
    %16 = arith.addf %10, %13 : vector<8x128xf32>
    %17 = arith.negf %16 : vector<8x128xf32>
    %18 = math.exp %17 : vector<8x128xf32>
    %cst_9 = arith.constant 1.000000e+00 : f32
    %19 = vector.broadcast %cst_9 : f32 to vector<8x128xf32>
    %20 = arith.addf %19, %18 : vector<8x128xf32>
    %21 = arith.divf %19, %20 : vector<8x128xf32>
    %22 = arith.addf %11, %14 : vector<8x128xf32>
    %23 = arith.negf %22 : vector<8x128xf32>
    %24 = math.exp %23 : vector<8x128xf32>
    %cst_10 = arith.constant 1.000000e+00 : f32
    %25 = vector.broadcast %cst_10 : f32 to vector<8x128xf32>
    %26 = arith.addf %25, %24 : vector<8x128xf32>
    %27 = arith.divf %25, %26 : vector<8x128xf32>
    %28 = vector.broadcast %3 : vector<1x128xf32> to vector<8x128xf32>
    %29 = arith.addf %15, %28 : vector<8x128xf32>
    %30 = arith.mulf %21, %29 : vector<8x128xf32>
    %31 = arith.addf %12, %30 : vector<8x128xf32>
    %32 = math.tanh %31 : vector<8x128xf32>
    %cst_11 = arith.constant 1.000000e+00 : f32
    %33 = vector.broadcast %cst_11 : f32 to vector<8x128xf32>
    %34 = arith.subf %33, %27 : vector<8x128xf32>
    %35 = arith.mulf %34, %32 : vector<8x128xf32>
    %36 = arith.mulf %27, %4 : vector<8x128xf32>
    %37 = arith.addf %35, %36 : vector<8x128xf32>
    %c1_i32 = arith.constant 1 : i32
    %38 = arith.index_cast %c1_i32 : i32 to index
    %c0_12 = arith.constant 0 : index
    %c0_13 = arith.constant 0 : index
    %39 = vector.load %arg2[%38, %c0_12, %c0_13] : memref<8x8x384xf32, #tpu.memory_space<vmem>>, vector<1x8x384xf32>
    %40 = vector.shape_cast %39 : vector<1x8x384xf32> to vector<8x384xf32>
    %c0_14 = arith.constant 0 : index
    %c0_15 = arith.constant 0 : index
    %41 = vector.load %arg4[%c0_14, %c0_15] : memref<128x384xf32, #tpu.memory_space<vmem>>, vector<128x384xf32>
    %cst_16 = arith.constant dense<0.000000e+00> : vector<8x384xf32>
    %42 = tpu.matmul %37, %41, %cst_16 {dimension_numbers = #tpu.dot_dimension_numbers<[1], [0], [0], [1], [0, 0, 1, 1], [], []>} : vector<8x128xf32>, vector<128x384xf32>, vector<8x384xf32> -> vector<8x384xf32>
    %43 = vector.extract_strided_slice %40 {offsets = [0, 0], sizes = [8, 128], strides = [1, 1]} : vector<8x384xf32> to vector<8x128xf32>
    %44 = vector.extract_strided_slice %40 {offsets = [0, 128], sizes = [8, 128], strides = [1, 1]} : vector<8x384xf32> to vector<8x128xf32>
    %45 = vector.extract_strided_slice %40 {offsets = [0, 256], sizes = [8, 128], strides = [1, 1]} : vector<8x384xf32> to vector<8x128xf32>
    %46 = vector.extract_strided_slice %42 {offsets = [0, 0], sizes = [8, 128], strides = [1, 1]} : vector<8x384xf32> to vector<8x128xf32>
    %47 = vector.extract_strided_slice %42 {offsets = [0, 128], sizes = [8, 128], strides = [1, 1]} : vector<8x384xf32> to vector<8x128xf32>
    %48 = vector.extract_strided_slice %42 {offsets = [0, 256], sizes = [8, 128], strides = [1, 1]} : vector<8x384xf32> to vector<8x128xf32>
    %49 = arith.addf %43, %46 : vector<8x128xf32>
    %50 = arith.negf %49 : vector<8x128xf32>
    %51 = math.exp %50 : vector<8x128xf32>
    %cst_17 = arith.constant 1.000000e+00 : f32
    %52 = vector.broadcast %cst_17 : f32 to vector<8x128xf32>
    %53 = arith.addf %52, %51 : vector<8x128xf32>
    %54 = arith.divf %52, %53 : vector<8x128xf32>
    %55 = arith.addf %44, %47 : vector<8x128xf32>
    %56 = arith.negf %55 : vector<8x128xf32>
    %57 = math.exp %56 : vector<8x128xf32>
    %cst_18 = arith.constant 1.000000e+00 : f32
    %58 = vector.broadcast %cst_18 : f32 to vector<8x128xf32>
    %59 = arith.addf %58, %57 : vector<8x128xf32>
    %60 = arith.divf %58, %59 : vector<8x128xf32>
    %61 = vector.broadcast %3 : vector<1x128xf32> to vector<8x128xf32>
    %62 = arith.addf %48, %61 : vector<8x128xf32>
    %63 = arith.mulf %54, %62 : vector<8x128xf32>
    %64 = arith.addf %45, %63 : vector<8x128xf32>
    %65 = math.tanh %64 : vector<8x128xf32>
    %cst_19 = arith.constant 1.000000e+00 : f32
    %66 = vector.broadcast %cst_19 : f32 to vector<8x128xf32>
    %67 = arith.subf %66, %60 : vector<8x128xf32>
    %68 = arith.mulf %67, %65 : vector<8x128xf32>
    %69 = arith.mulf %60, %37 : vector<8x128xf32>
    %70 = arith.addf %68, %69 : vector<8x128xf32>
    %c2_i32 = arith.constant 2 : i32
    %71 = arith.index_cast %c2_i32 : i32 to index
    %c0_20 = arith.constant 0 : index
    %c0_21 = arith.constant 0 : index
    %72 = vector.load %arg2[%71, %c0_20, %c0_21] : memref<8x8x384xf32, #tpu.memory_space<vmem>>, vector<1x8x384xf32>
    %73 = vector.shape_cast %72 : vector<1x8x384xf32> to vector<8x384xf32>
    %c0_22 = arith.constant 0 : index
    %c0_23 = arith.constant 0 : index
    %74 = vector.load %arg4[%c0_22, %c0_23] : memref<128x384xf32, #tpu.memory_space<vmem>>, vector<128x384xf32>
    %cst_24 = arith.constant dense<0.000000e+00> : vector<8x384xf32>
    %75 = tpu.matmul %70, %74, %cst_24 {dimension_numbers = #tpu.dot_dimension_numbers<[1], [0], [0], [1], [0, 0, 1, 1], [], []>} : vector<8x128xf32>, vector<128x384xf32>, vector<8x384xf32> -> vector<8x384xf32>
    %76 = vector.extract_strided_slice %73 {offsets = [0, 0], sizes = [8, 128], strides = [1, 1]} : vector<8x384xf32> to vector<8x128xf32>
    %77 = vector.extract_strided_slice %73 {offsets = [0, 128], sizes = [8, 128], strides = [1, 1]} : vector<8x384xf32> to vector<8x128xf32>
    %78 = vector.extract_strided_slice %73 {offsets = [0, 256], sizes = [8, 128], strides = [1, 1]} : vector<8x384xf32> to vector<8x128xf32>
    %79 = vector.extract_strided_slice %75 {offsets = [0, 0], sizes = [8, 128], strides = [1, 1]} : vector<8x384xf32> to vector<8x128xf32>
    %80 = vector.extract_strided_slice %75 {offsets = [0, 128], sizes = [8, 128], strides = [1, 1]} : vector<8x384xf32> to vector<8x128xf32>
    %81 = vector.extract_strided_slice %75 {offsets = [0, 256], sizes = [8, 128], strides = [1, 1]} : vector<8x384xf32> to vector<8x128xf32>
    %82 = arith.addf %76, %79 : vector<8x128xf32>
    %83 = arith.negf %82 : vector<8x128xf32>
    %84 = math.exp %83 : vector<8x128xf32>
    %cst_25 = arith.constant 1.000000e+00 : f32
    %85 = vector.broadcast %cst_25 : f32 to vector<8x128xf32>
    %86 = arith.addf %85, %84 : vector<8x128xf32>
    %87 = arith.divf %85, %86 : vector<8x128xf32>
    %88 = arith.addf %77, %80 : vector<8x128xf32>
    %89 = arith.negf %88 : vector<8x128xf32>
    %90 = math.exp %89 : vector<8x128xf32>
    %cst_26 = arith.constant 1.000000e+00 : f32
    %91 = vector.broadcast %cst_26 : f32 to vector<8x128xf32>
    %92 = arith.addf %91, %90 : vector<8x128xf32>
    %93 = arith.divf %91, %92 : vector<8x128xf32>
    %94 = vector.broadcast %3 : vector<1x128xf32> to vector<8x128xf32>
    %95 = arith.addf %81, %94 : vector<8x128xf32>
    %96 = arith.mulf %87, %95 : vector<8x128xf32>
    %97 = arith.addf %78, %96 : vector<8x128xf32>
    %98 = math.tanh %97 : vector<8x128xf32>
    %cst_27 = arith.constant 1.000000e+00 : f32
    %99 = vector.broadcast %cst_27 : f32 to vector<8x128xf32>
    %100 = arith.subf %99, %93 : vector<8x128xf32>
    %101 = arith.mulf %100, %98 : vector<8x128xf32>
    %102 = arith.mulf %93, %70 : vector<8x128xf32>
    %103 = arith.addf %101, %102 : vector<8x128xf32>
    %c3_i32 = arith.constant 3 : i32
    %104 = arith.index_cast %c3_i32 : i32 to index
    %c0_28 = arith.constant 0 : index
    %c0_29 = arith.constant 0 : index
    %105 = vector.load %arg2[%104, %c0_28, %c0_29] : memref<8x8x384xf32, #tpu.memory_space<vmem>>, vector<1x8x384xf32>
    %106 = vector.shape_cast %105 : vector<1x8x384xf32> to vector<8x384xf32>
    %c0_30 = arith.constant 0 : index
    %c0_31 = arith.constant 0 : index
    %107 = vector.load %arg4[%c0_30, %c0_31] : memref<128x384xf32, #tpu.memory_space<vmem>>, vector<128x384xf32>
    %cst_32 = arith.constant dense<0.000000e+00> : vector<8x384xf32>
    %108 = tpu.matmul %103, %107, %cst_32 {dimension_numbers = #tpu.dot_dimension_numbers<[1], [0], [0], [1], [0, 0, 1, 1], [], []>} : vector<8x128xf32>, vector<128x384xf32>, vector<8x384xf32> -> vector<8x384xf32>
    %109 = vector.extract_strided_slice %106 {offsets = [0, 0], sizes = [8, 128], strides = [1, 1]} : vector<8x384xf32> to vector<8x128xf32>
    %110 = vector.extract_strided_slice %106 {offsets = [0, 128], sizes = [8, 128], strides = [1, 1]} : vector<8x384xf32> to vector<8x128xf32>
    %111 = vector.extract_strided_slice %106 {offsets = [0, 256], sizes = [8, 128], strides = [1, 1]} : vector<8x384xf32> to vector<8x128xf32>
    %112 = vector.extract_strided_slice %108 {offsets = [0, 0], sizes = [8, 128], strides = [1, 1]} : vector<8x384xf32> to vector<8x128xf32>
    %113 = vector.extract_strided_slice %108 {offsets = [0, 128], sizes = [8, 128], strides = [1, 1]} : vector<8x384xf32> to vector<8x128xf32>
    %114 = vector.extract_strided_slice %108 {offsets = [0, 256], sizes = [8, 128], strides = [1, 1]} : vector<8x384xf32> to vector<8x128xf32>
    %115 = arith.addf %109, %112 : vector<8x128xf32>
    %116 = arith.negf %115 : vector<8x128xf32>
    %117 = math.exp %116 : vector<8x128xf32>
    %cst_33 = arith.constant 1.000000e+00 : f32
    %118 = vector.broadcast %cst_33 : f32 to vector<8x128xf32>
    %119 = arith.addf %118, %117 : vector<8x128xf32>
    %120 = arith.divf %118, %119 : vector<8x128xf32>
    %121 = arith.addf %110, %113 : vector<8x128xf32>
    %122 = arith.negf %121 : vector<8x128xf32>
    %123 = math.exp %122 : vector<8x128xf32>
    %cst_34 = arith.constant 1.000000e+00 : f32
    %124 = vector.broadcast %cst_34 : f32 to vector<8x128xf32>
    %125 = arith.addf %124, %123 : vector<8x128xf32>
    %126 = arith.divf %124, %125 : vector<8x128xf32>
    %127 = vector.broadcast %3 : vector<1x128xf32> to vector<8x128xf32>
    %128 = arith.addf %114, %127 : vector<8x128xf32>
    %129 = arith.mulf %120, %128 : vector<8x128xf32>
    %130 = arith.addf %111, %129 : vector<8x128xf32>
    %131 = math.tanh %130 : vector<8x128xf32>
    %cst_35 = arith.constant 1.000000e+00 : f32
    %132 = vector.broadcast %cst_35 : f32 to vector<8x128xf32>
    %133 = arith.subf %132, %126 : vector<8x128xf32>
    %134 = arith.mulf %133, %131 : vector<8x128xf32>
    %135 = arith.mulf %126, %103 : vector<8x128xf32>
    %136 = arith.addf %134, %135 : vector<8x128xf32>
    %c4_i32 = arith.constant 4 : i32
    %137 = arith.index_cast %c4_i32 : i32 to index
    %c0_36 = arith.constant 0 : index
    %c0_37 = arith.constant 0 : index
    %138 = vector.load %arg2[%137, %c0_36, %c0_37] : memref<8x8x384xf32, #tpu.memory_space<vmem>>, vector<1x8x384xf32>
    %139 = vector.shape_cast %138 : vector<1x8x384xf32> to vector<8x384xf32>
    %c0_38 = arith.constant 0 : index
    %c0_39 = arith.constant 0 : index
    %140 = vector.load %arg4[%c0_38, %c0_39] : memref<128x384xf32, #tpu.memory_space<vmem>>, vector<128x384xf32>
    %cst_40 = arith.constant dense<0.000000e+00> : vector<8x384xf32>
    %141 = tpu.matmul %136, %140, %cst_40 {dimension_numbers = #tpu.dot_dimension_numbers<[1], [0], [0], [1], [0, 0, 1, 1], [], []>} : vector<8x128xf32>, vector<128x384xf32>, vector<8x384xf32> -> vector<8x384xf32>
    %142 = vector.extract_strided_slice %139 {offsets = [0, 0], sizes = [8, 128], strides = [1, 1]} : vector<8x384xf32> to vector<8x128xf32>
    %143 = vector.extract_strided_slice %139 {offsets = [0, 128], sizes = [8, 128], strides = [1, 1]} : vector<8x384xf32> to vector<8x128xf32>
    %144 = vector.extract_strided_slice %139 {offsets = [0, 256], sizes = [8, 128], strides = [1, 1]} : vector<8x384xf32> to vector<8x128xf32>
    %145 = vector.extract_strided_slice %141 {offsets = [0, 0], sizes = [8, 128], strides = [1, 1]} : vector<8x384xf32> to vector<8x128xf32>
    %146 = vector.extract_strided_slice %141 {offsets = [0, 128], sizes = [8, 128], strides = [1, 1]} : vector<8x384xf32> to vector<8x128xf32>
    %147 = vector.extract_strided_slice %141 {offsets = [0, 256], sizes = [8, 128], strides = [1, 1]} : vector<8x384xf32> to vector<8x128xf32>
    %148 = arith.addf %142, %145 : vector<8x128xf32>
    %149 = arith.negf %148 : vector<8x128xf32>
    %150 = math.exp %149 : vector<8x128xf32>
    %cst_41 = arith.constant 1.000000e+00 : f32
    %151 = vector.broadcast %cst_41 : f32 to vector<8x128xf32>
    %152 = arith.addf %151, %150 : vector<8x128xf32>
    %153 = arith.divf %151, %152 : vector<8x128xf32>
    %154 = arith.addf %143, %146 : vector<8x128xf32>
    %155 = arith.negf %154 : vector<8x128xf32>
    %156 = math.exp %155 : vector<8x128xf32>
    %cst_42 = arith.constant 1.000000e+00 : f32
    %157 = vector.broadcast %cst_42 : f32 to vector<8x128xf32>
    %158 = arith.addf %157, %156 : vector<8x128xf32>
    %159 = arith.divf %157, %158 : vector<8x128xf32>
    %160 = vector.broadcast %3 : vector<1x128xf32> to vector<8x128xf32>
    %161 = arith.addf %147, %160 : vector<8x128xf32>
    %162 = arith.mulf %153, %161 : vector<8x128xf32>
    %163 = arith.addf %144, %162 : vector<8x128xf32>
    %164 = math.tanh %163 : vector<8x128xf32>
    %cst_43 = arith.constant 1.000000e+00 : f32
    %165 = vector.broadcast %cst_43 : f32 to vector<8x128xf32>
    %166 = arith.subf %165, %159 : vector<8x128xf32>
    %167 = arith.mulf %166, %164 : vector<8x128xf32>
    %168 = arith.mulf %159, %136 : vector<8x128xf32>
    %169 = arith.addf %167, %168 : vector<8x128xf32>
    %c5_i32 = arith.constant 5 : i32
    %170 = arith.index_cast %c5_i32 : i32 to index
    %c0_44 = arith.constant 0 : index
    %c0_45 = arith.constant 0 : index
    %171 = vector.load %arg2[%170, %c0_44, %c0_45] : memref<8x8x384xf32, #tpu.memory_space<vmem>>, vector<1x8x384xf32>
    %172 = vector.shape_cast %171 : vector<1x8x384xf32> to vector<8x384xf32>
    %c0_46 = arith.constant 0 : index
    %c0_47 = arith.constant 0 : index
    %173 = vector.load %arg4[%c0_46, %c0_47] : memref<128x384xf32, #tpu.memory_space<vmem>>, vector<128x384xf32>
    %cst_48 = arith.constant dense<0.000000e+00> : vector<8x384xf32>
    %174 = tpu.matmul %169, %173, %cst_48 {dimension_numbers = #tpu.dot_dimension_numbers<[1], [0], [0], [1], [0, 0, 1, 1], [], []>} : vector<8x128xf32>, vector<128x384xf32>, vector<8x384xf32> -> vector<8x384xf32>
    %175 = vector.extract_strided_slice %172 {offsets = [0, 0], sizes = [8, 128], strides = [1, 1]} : vector<8x384xf32> to vector<8x128xf32>
    %176 = vector.extract_strided_slice %172 {offsets = [0, 128], sizes = [8, 128], strides = [1, 1]} : vector<8x384xf32> to vector<8x128xf32>
    %177 = vector.extract_strided_slice %172 {offsets = [0, 256], sizes = [8, 128], strides = [1, 1]} : vector<8x384xf32> to vector<8x128xf32>
    %178 = vector.extract_strided_slice %174 {offsets = [0, 0], sizes = [8, 128], strides = [1, 1]} : vector<8x384xf32> to vector<8x128xf32>
    %179 = vector.extract_strided_slice %174 {offsets = [0, 128], sizes = [8, 128], strides = [1, 1]} : vector<8x384xf32> to vector<8x128xf32>
    %180 = vector.extract_strided_slice %174 {offsets = [0, 256], sizes = [8, 128], strides = [1, 1]} : vector<8x384xf32> to vector<8x128xf32>
    %181 = arith.addf %175, %178 : vector<8x128xf32>
    %182 = arith.negf %181 : vector<8x128xf32>
    %183 = math.exp %182 : vector<8x128xf32>
    %cst_49 = arith.constant 1.000000e+00 : f32
    %184 = vector.broadcast %cst_49 : f32 to vector<8x128xf32>
    %185 = arith.addf %184, %183 : vector<8x128xf32>
    %186 = arith.divf %184, %185 : vector<8x128xf32>
    %187 = arith.addf %176, %179 : vector<8x128xf32>
    %188 = arith.negf %187 : vector<8x128xf32>
    %189 = math.exp %188 : vector<8x128xf32>
    %cst_50 = arith.constant 1.000000e+00 : f32
    %190 = vector.broadcast %cst_50 : f32 to vector<8x128xf32>
    %191 = arith.addf %190, %189 : vector<8x128xf32>
    %192 = arith.divf %190, %191 : vector<8x128xf32>
    %193 = vector.broadcast %3 : vector<1x128xf32> to vector<8x128xf32>
    %194 = arith.addf %180, %193 : vector<8x128xf32>
    %195 = arith.mulf %186, %194 : vector<8x128xf32>
    %196 = arith.addf %177, %195 : vector<8x128xf32>
    %197 = math.tanh %196 : vector<8x128xf32>
    %cst_51 = arith.constant 1.000000e+00 : f32
    %198 = vector.broadcast %cst_51 : f32 to vector<8x128xf32>
    %199 = arith.subf %198, %192 : vector<8x128xf32>
    %200 = arith.mulf %199, %197 : vector<8x128xf32>
    %201 = arith.mulf %192, %169 : vector<8x128xf32>
    %202 = arith.addf %200, %201 : vector<8x128xf32>
    %c6_i32 = arith.constant 6 : i32
    %203 = arith.index_cast %c6_i32 : i32 to index
    %c0_52 = arith.constant 0 : index
    %c0_53 = arith.constant 0 : index
    %204 = vector.load %arg2[%203, %c0_52, %c0_53] : memref<8x8x384xf32, #tpu.memory_space<vmem>>, vector<1x8x384xf32>
    %205 = vector.shape_cast %204 : vector<1x8x384xf32> to vector<8x384xf32>
    %c0_54 = arith.constant 0 : index
    %c0_55 = arith.constant 0 : index
    %206 = vector.load %arg4[%c0_54, %c0_55] : memref<128x384xf32, #tpu.memory_space<vmem>>, vector<128x384xf32>
    %cst_56 = arith.constant dense<0.000000e+00> : vector<8x384xf32>
    %207 = tpu.matmul %202, %206, %cst_56 {dimension_numbers = #tpu.dot_dimension_numbers<[1], [0], [0], [1], [0, 0, 1, 1], [], []>} : vector<8x128xf32>, vector<128x384xf32>, vector<8x384xf32> -> vector<8x384xf32>
    %208 = vector.extract_strided_slice %205 {offsets = [0, 0], sizes = [8, 128], strides = [1, 1]} : vector<8x384xf32> to vector<8x128xf32>
    %209 = vector.extract_strided_slice %205 {offsets = [0, 128], sizes = [8, 128], strides = [1, 1]} : vector<8x384xf32> to vector<8x128xf32>
    %210 = vector.extract_strided_slice %205 {offsets = [0, 256], sizes = [8, 128], strides = [1, 1]} : vector<8x384xf32> to vector<8x128xf32>
    %211 = vector.extract_strided_slice %207 {offsets = [0, 0], sizes = [8, 128], strides = [1, 1]} : vector<8x384xf32> to vector<8x128xf32>
    %212 = vector.extract_strided_slice %207 {offsets = [0, 128], sizes = [8, 128], strides = [1, 1]} : vector<8x384xf32> to vector<8x128xf32>
    %213 = vector.extract_strided_slice %207 {offsets = [0, 256], sizes = [8, 128], strides = [1, 1]} : vector<8x384xf32> to vector<8x128xf32>
    %214 = arith.addf %208, %211 : vector<8x128xf32>
    %215 = arith.negf %214 : vector<8x128xf32>
    %216 = math.exp %215 : vector<8x128xf32>
    %cst_57 = arith.constant 1.000000e+00 : f32
    %217 = vector.broadcast %cst_57 : f32 to vector<8x128xf32>
    %218 = arith.addf %217, %216 : vector<8x128xf32>
    %219 = arith.divf %217, %218 : vector<8x128xf32>
    %220 = arith.addf %209, %212 : vector<8x128xf32>
    %221 = arith.negf %220 : vector<8x128xf32>
    %222 = math.exp %221 : vector<8x128xf32>
    %cst_58 = arith.constant 1.000000e+00 : f32
    %223 = vector.broadcast %cst_58 : f32 to vector<8x128xf32>
    %224 = arith.addf %223, %222 : vector<8x128xf32>
    %225 = arith.divf %223, %224 : vector<8x128xf32>
    %226 = vector.broadcast %3 : vector<1x128xf32> to vector<8x128xf32>
    %227 = arith.addf %213, %226 : vector<8x128xf32>
    %228 = arith.mulf %219, %227 : vector<8x128xf32>
    %229 = arith.addf %210, %228 : vector<8x128xf32>
    %230 = math.tanh %229 : vector<8x128xf32>
    %cst_59 = arith.constant 1.000000e+00 : f32
    %231 = vector.broadcast %cst_59 : f32 to vector<8x128xf32>
    %232 = arith.subf %231, %225 : vector<8x128xf32>
    %233 = arith.mulf %232, %230 : vector<8x128xf32>
    %234 = arith.mulf %225, %202 : vector<8x128xf32>
    %235 = arith.addf %233, %234 : vector<8x128xf32>
    %c7_i32 = arith.constant 7 : i32
    %236 = arith.index_cast %c7_i32 : i32 to index
    %c0_60 = arith.constant 0 : index
    %c0_61 = arith.constant 0 : index
    %237 = vector.load %arg2[%236, %c0_60, %c0_61] : memref<8x8x384xf32, #tpu.memory_space<vmem>>, vector<1x8x384xf32>
    %238 = vector.shape_cast %237 : vector<1x8x384xf32> to vector<8x384xf32>
    %c0_62 = arith.constant 0 : index
    %c0_63 = arith.constant 0 : index
    %239 = vector.load %arg4[%c0_62, %c0_63] : memref<128x384xf32, #tpu.memory_space<vmem>>, vector<128x384xf32>
    %cst_64 = arith.constant dense<0.000000e+00> : vector<8x384xf32>
    %240 = tpu.matmul %235, %239, %cst_64 {dimension_numbers = #tpu.dot_dimension_numbers<[1], [0], [0], [1], [0, 0, 1, 1], [], []>} : vector<8x128xf32>, vector<128x384xf32>, vector<8x384xf32> -> vector<8x384xf32>
    %241 = vector.extract_strided_slice %238 {offsets = [0, 0], sizes = [8, 128], strides = [1, 1]} : vector<8x384xf32> to vector<8x128xf32>
    %242 = vector.extract_strided_slice %238 {offsets = [0, 128], sizes = [8, 128], strides = [1, 1]} : vector<8x384xf32> to vector<8x128xf32>
    %243 = vector.extract_strided_slice %238 {offsets = [0, 256], sizes = [8, 128], strides = [1, 1]} : vector<8x384xf32> to vector<8x128xf32>
    %244 = vector.extract_strided_slice %240 {offsets = [0, 0], sizes = [8, 128], strides = [1, 1]} : vector<8x384xf32> to vector<8x128xf32>
    %245 = vector.extract_strided_slice %240 {offsets = [0, 128], sizes = [8, 128], strides = [1, 1]} : vector<8x384xf32> to vector<8x128xf32>
    %246 = vector.extract_strided_slice %240 {offsets = [0, 256], sizes = [8, 128], strides = [1, 1]} : vector<8x384xf32> to vector<8x128xf32>
    %247 = arith.addf %241, %244 : vector<8x128xf32>
    %248 = arith.negf %247 : vector<8x128xf32>
    %249 = math.exp %248 : vector<8x128xf32>
    %cst_65 = arith.constant 1.000000e+00 : f32
    %250 = vector.broadcast %cst_65 : f32 to vector<8x128xf32>
    %251 = arith.addf %250, %249 : vector<8x128xf32>
    %252 = arith.divf %250, %251 : vector<8x128xf32>
    %253 = arith.addf %242, %245 : vector<8x128xf32>
    %254 = arith.negf %253 : vector<8x128xf32>
    %255 = math.exp %254 : vector<8x128xf32>
    %cst_66 = arith.constant 1.000000e+00 : f32
    %256 = vector.broadcast %cst_66 : f32 to vector<8x128xf32>
    %257 = arith.addf %256, %255 : vector<8x128xf32>
    %258 = arith.divf %256, %257 : vector<8x128xf32>
    %259 = vector.broadcast %3 : vector<1x128xf32> to vector<8x128xf32>
    %260 = arith.addf %246, %259 : vector<8x128xf32>
    %261 = arith.mulf %252, %260 : vector<8x128xf32>
    %262 = arith.addf %243, %261 : vector<8x128xf32>
    %263 = math.tanh %262 : vector<8x128xf32>
    %cst_67 = arith.constant 1.000000e+00 : f32
    %264 = vector.broadcast %cst_67 : f32 to vector<8x128xf32>
    %265 = arith.subf %264, %258 : vector<8x128xf32>
    %266 = arith.mulf %265, %263 : vector<8x128xf32>
    %267 = arith.mulf %258, %235 : vector<8x128xf32>
    %268 = arith.addf %266, %267 : vector<8x128xf32>
    %c8_i32 = arith.constant 8 : i32
    %c0_68 = arith.constant 0 : index
    %c0_69 = arith.constant 0 : index
    %269 = vector.load %arg10[%c0_68, %c0_69] : memref<8x128xf32, #tpu.memory_space<vmem>>, vector<8x128xf32>
    tpu.vector_store %arg10[%c0_68, %c0_69], %268 {strides = array<i32>} : memref<8x128xf32, #tpu.memory_space<vmem>>, vector<8x128xf32>,
    %c0_i32_70 = arith.constant 0 : i32
    %270 = arith.cmpi eq, %arg1, %c0_i32_70 : i32
    %271 = arith.extui %270 : i1 to i32
    %c0_i32_71 = arith.constant 0 : i32
    %272 = arith.cmpi ne, %271, %c0_i32_71 : i32
    scf.if %272 {
      %c0_72 = arith.constant 0 : index
      %c0_73 = arith.constant 0 : index
      %273 = vector.load %arg9[%c0_72, %c0_73] : memref<8x128xf32, #tpu.memory_space<vmem>>, vector<8x128xf32>
      tpu.vector_store %arg9[%c0_72, %c0_73], %268 {strides = array<i32>} : memref<8x128xf32, #tpu.memory_space<vmem>>, vector<8x128xf32>,
      %cst_74 = arith.constant 0.000000e+00 : f32
      %274 = vector.broadcast %cst_74 : f32 to vector<8x128xf32>
      %275 = arith.maximumf %268, %274 : vector<8x128xf32>
      %c0_75 = arith.constant 0 : index
      %c0_76 = arith.constant 0 : index
      %276 = vector.load %arg6[%c0_75, %c0_76] : memref<128x128xf32, #tpu.memory_space<vmem>>, vector<128x128xf32>
      %cst_77 = arith.constant dense<0.000000e+00> : vector<8x128xf32>
      %277 = tpu.matmul %275, %276, %cst_77 {dimension_numbers = #tpu.dot_dimension_numbers<[1], [0], [0], [1], [0, 0, 1, 1], [], []>} : vector<8x128xf32>, vector<128x128xf32>, vector<8x128xf32> -> vector<8x128xf32>
      %c0_78 = arith.constant 0 : index
      %c0_79 = arith.constant 0 : index
      %278 = vector.load %arg7[%c0_78, %c0_79] : memref<1x128xf32, #tpu.memory_space<vmem>>, vector<1x128xf32>
      %279 = vector.broadcast %278 : vector<1x128xf32> to vector<8x128xf32>
      %280 = arith.addf %277, %279 : vector<8x128xf32>
      %c0_80 = arith.constant 0 : index
      %c0_81 = arith.constant 0 : index
      %281 = vector.load %arg8[%c0_80, %c0_81] : memref<8x128xf32, #tpu.memory_space<vmem>>, vector<8x128xf32>
      tpu.vector_store %arg8[%c0_80, %c0_81], %280 {strides = array<i32>} : memref<8x128xf32, #tpu.memory_space<vmem>>, vector<8x128xf32>,
    } else {
    }
    return
  }
  func.func @transform_0(%arg0: i32, %arg1: i32) -> (i32, i32, i32) {
    %c0_i32 = arith.constant 0 : i32
    %c0_i32_0 = arith.constant 0 : i32
    return %arg1, %arg0, %c0_i32 : i32, i32, i32
  }
  func.func @transform_1(%arg0: i32, %arg1: i32) -> (i32, i32) {
    %c0_i32 = arith.constant 0 : i32
    %c0_i32_0 = arith.constant 0 : i32
    return %arg0, %c0_i32 : i32, i32
  }
  func.func @transform_2(%arg0: i32, %arg1: i32) -> (i32, i32) {
    %c0_i32 = arith.constant 0 : i32
    %c0_i32_0 = arith.constant 0 : i32
    %c0_i32_1 = arith.constant 0 : i32
    return %c0_i32, %c0_i32_0 : i32, i32
  }
  func.func @transform_3(%arg0: i32, %arg1: i32) -> (i32, i32) {
    %c0_i32 = arith.constant 0 : i32
    %c0_i32_0 = arith.constant 0 : i32
    %c0_i32_1 = arith.constant 0 : i32
    return %c0_i32, %c0_i32_0 : i32, i32
  }
  func.func @transform_4(%arg0: i32, %arg1: i32) -> (i32, i32) {
    %c0_i32 = arith.constant 0 : i32
    %c0_i32_0 = arith.constant 0 : i32
    %c0_i32_1 = arith.constant 0 : i32
    return %c0_i32, %c0_i32_0 : i32, i32
  }
  func.func @transform_5(%arg0: i32, %arg1: i32) -> (i32, i32) {
    %c0_i32 = arith.constant 0 : i32
    %c0_i32_0 = arith.constant 0 : i32
    %c0_i32_1 = arith.constant 0 : i32
    return %c0_i32, %c0_i32_0 : i32, i32
  }
  func.func @transform_6(%arg0: i32, %arg1: i32) -> (i32, i32) {
    %c0_i32 = arith.constant 0 : i32
    %c0_i32_0 = arith.constant 0 : i32
    return %arg0, %c0_i32 : i32, i32
  }
  func.func @transform_7(%arg0: i32, %arg1: i32) -> (i32, i32) {
    %c0_i32 = arith.constant 0 : i32
    %c0_i32_0 = arith.constant 0 : i32
    return %arg0, %c0_i32 : i32, i32
  }
}

</mosaic_0001>

<bundles_post_ra>
// kernel: gru_net_forward.1
= control target key start
LH: loop header
LB: loop body
LE: loop exit
PB: predicated region body
PF: predicated region fallthrough
CT: control target
= control target key end

     0   :  { %13 = vsyncpa [#allocation4], 0  ;;  %s1248_s27 = smov [#allocation3]   ;;  %s1249_s29 = smov 384   ;;  %s1966_s0 = inlined_call_operand.vmem [shape: f32[8,8,384], index: 0, kind: input, shape index: {}]   ;;  %s1967_s1 = inlined_call_operand.vmem [shape: f32[8,128], index: 1, kind: input, shape index: {}]   ;;  %s1968_s2 = inlined_call_operand.hbm [shape: f32[128,384], index: 2, kind: input, shape index: {}]   ;;  %s1969_s3 = inlined_call_operand.vmem [shape: f32[1,128], index: 3, kind: input, shape index: {}]   ;;  %s1970_s4 = inlined_call_operand.vmem [shape: f32[128,128], index: 4, kind: input, shape index: {}]   ;;  %s1971_s5 = inlined_call_operand.vmem [shape: f32[1,128], index: 5, kind: input, shape index: {}]   ;;  %s1972_s6 = inlined_call_operand.vmem [shape: f32[8,128], index: 6, kind: output, shape index: {0}]   ;;  %s1973_s7 = inlined_call_operand.vmem [shape: f32[8,128], index: 7, kind: output, shape index: {1}]  }
   0x1   :  { %s22_s26 = sshll.u32 %s1968_s2, 4  ;;  %s24_s28 = sshll.u32 %s1248_s27, 4  ;;  %s23_s26 = int_to_ptr.hbm [resolvable:$true] %s22_s26  ;;  %s25_s28 = int_to_ptr.vmem [resolvable:$true] %s24_s28 }
   0x2   :  { %s1250_s30 = smov 24  }
   0x3   :  { %30 = dma.hbm_to_vmem [thread:$0]  %s23_s26, 6144, %s25_s28, [#allocation4], %s1249_s29, %s1249_s29, %s1250_s30  }
   0x4   :  { %1246 = dma.done.wait [#allocation4], 6144  }
   0x5   :  { %1247 = vsyncadd [#allocation4], 4294961152  ;;  %v1294_v0 = vld [vmem:[#allocation3 + $0x168] sm:$0xff]  ;;  %v1296_v1 = vld [vmem:[#allocation3 + $0x170] sm:$0xff] }
   0x6   :  { %v1298_v2 = vld [vmem:[#allocation3 + $0x150] sm:$0xff]  ;;  %100 = vmatpush.msra.mxu0 %v1294_v0  ;;  %120 = vmatpush.msra.mxu1 %v1296_v1  ;;  %v1302_v3 = vld [vmem:[#allocation3 + $0x158] sm:$0xff]  ;;  %v1306_v5 = vld [vmem:[#allocation3 + $0x140] sm:$0xff] }
   0x7   :  { %v1304_v4 = vld [vmem:[#allocation3 + $0x138] sm:$0xff]  ;;  %215 = vmatpush.msra.mxu3 %v1294_v0  ;;  %v1311_v6 = vld [vmem:[#allocation3 + $0x120] sm:$0xff]  ;;  %v1313_v7 = vld [vmem:[#allocation3 + $0x128] sm:$0xff] }
   0x8   :  { %101 = vmatpush.msra.mxu0 %v1298_v2  ;;  %121 = vmatpush.msra.mxu1 %v1302_v3  ;;  %v1318_v8 = vld [vmem:[#allocation3 + $0x108] sm:$0xff]  ;;  %v1320_v9 = vld [vmem:[#allocation3 + $0x110] sm:$0xff]  ;;  %v1327_v11 = vld [vmem:[#allocation3 + $0xf8] sm:$0xff] }
   0x9   :  { %216 = vmatpush.msra.mxu3 %v1298_v2  ;;  %v1325_v10 = vld [vmem:[#allocation3 + $0xf0] sm:$0xff]  ;;  %v1329_v12 = vld [vmem:[#allocation3 + $0x178] sm:$0xff]  ;;  %v1334_v13 = vld [vmem:[#allocation3 + $0x160] sm:$0xff] }
   0xa   :  { %102 = vmatpush.msra.mxu0 %v1304_v4  ;;  %122 = vmatpush.msra.mxu1 %v1306_v5  ;;  %v1336_v14 = vld [vmem:[#allocation3 + $0xd8] sm:$0xff]  ;;  %v1338_v15 = vld [vmem:[#allocation3 + $0xe0] sm:$0xff]  ;;  %v1344_v16 = vld [vmem:[#allocation3 + $0x148] sm:$0xff] }
   0xb   :  { %217 = vmatpush.msra.mxu3 %v1304_v4  ;;  %140 = vmatpush.msra.mxu2 %v1329_v12  ;;  %v1346_v17 = vld [vmem:[#allocation3 + $0xc0] sm:$0xff]  ;;  %v1348_v18 = vld [vmem:[#allocation3 + $0xc8] sm:$0xff]  ;;  %v1354_v19 = vld [vmem:[#allocation3 + $0x130] sm:$0xff] }
   0xc   :  { %103 = vmatpush.msra.mxu0 %v1311_v6  ;;  %123 = vmatpush.msra.mxu1 %v1313_v7  ;;  %v1356_v20 = vld [vmem:[#allocation3 + $0xa8] sm:$0xff]  ;;  %v1358_v21 = vld [vmem:[#allocation3 + $0xb0] sm:$0xff]  ;;  %v1364_v22 = vld [vmem:[#allocation3 + $0x118] sm:$0xff] }
   0xd   :  { %218 = vmatpush.msra.mxu3 %v1311_v6  ;;  %141 = vmatpush.msra.mxu2 %v1334_v13  ;;  %v1366_v23 = vld [vmem:[#allocation3 + $0x90] sm:$0xff]  ;;  %v1368_v24 = vld [vmem:[#allocation3 + $0x98] sm:$0xff]  ;;  %v1374_v25 = vld [vmem:[#allocation3 + $0x100] sm:$0xff] }
   0xe   :  { %104 = vmatpush.msra.mxu0 %v1318_v8  ;;  %124 = vmatpush.msra.mxu1 %v1320_v9  ;;  %v1376_v26 = vld [vmem:[#allocation3 + $0x78] sm:$0xff]  ;;  %v1378_v27 = vld [vmem:[#allocation3 + $0x80] sm:$0xff]  ;;  %v1384_v28 = vld [vmem:[#allocation3 + $0xe8] sm:$0xff] }
   0xf   :  { %219 = vmatpush.msra.mxu3 %v1318_v8  ;;  %142 = vmatpush.msra.mxu2 %v1344_v16  ;;  %v1386_v29 = vld [vmem:[#allocation3 + $0x60] sm:$0xff]  ;;  %v1388_v30 = vld [vmem:[#allocation3 + $0x68] sm:$0xff]  ;;  %v1394_v31 = vld [vmem:[#allocation3 + $0xd0] sm:$0xff] }
  0x10   :  { %105 = vmatpush.msra.mxu0 %v1325_v10  ;;  %125 = vmatpush.msra.mxu1 %v1327_v11  ;;  %v1396_v32 = vld [vmem:[#allocation3 + $0x48] sm:$0xff]  ;;  %v1398_v33 = vld [vmem:[#allocation3 + $0x50] sm:$0xff]  ;;  %v1404_v34 = vld [vmem:[#allocation3 + $0xb8] sm:$0xff] }
  0x11   :  { %220 = vmatpush.msra.mxu3 %v1325_v10  ;;  %143 = vmatpush.msra.mxu2 %v1354_v19  ;;  %v1406_v35 = vld [vmem:[#allocation3 + $0x30] sm:$0xff]  ;;  %v1408_v36 = vld [vmem:[#allocation3 + $0x38] sm:$0xff]  ;;  %v1414_v37 = vld [vmem:[#allocation3 + $0xa0] sm:$0xff] }
  0x12   :  { %106 = vmatpush.msra.mxu0 %v1336_v14  ;;  %126 = vmatpush.msra.mxu1 %v1338_v15  ;;  %v1416_v38 = vld [vmem:[#allocation3 + $0x18] sm:$0xff]  ;;  %v1418_v39 = vld [vmem:[#allocation3 + $0x20] sm:$0xff]  ;;  %v1424_v40 = vld [vmem:[#allocation3 + $0x88] sm:$0xff] }
  0x13   :  { %221 = vmatpush.msra.mxu3 %v1336_v14  ;;  %144 = vmatpush.msra.mxu2 %v1364_v22  ;;  %1988 = vst [vmem:[#allocation6_spill] sm:$0xff] %v1416_v38  ;;  %v1426_v41 = vld [vmem:[#allocation3] sm:$0xff]  ;;  %v1428_v42 = vld [vmem:[#allocation3 + $0x8] sm:$0xff]  ;;  %v1440_v44 = vld [vmem:[#allocation3 + $0x70] sm:$0xff] }
  0x14   :  { %107 = vmatpush.msra.mxu0 %v1346_v17  ;;  %127 = vmatpush.msra.mxu1 %v1348_v18  ;;  %1989 = vst [vmem:[#allocation7_spill] sm:$0xff] %v1418_v39  ;;  %v1437_v43 = vld [vmem:[%s1967_s1] sm:$0xff]  ;;  %v1447_v45 = vld [vmem:[#allocation3 + $0x58] sm:$0xff]  ;;  %v1457_v47 = vld [vmem:[#allocation3 + $0x28] sm:$0xff] }
  0x15   :  { %222 = vmatpush.msra.mxu3 %v1346_v17  ;;  %145 = vmatpush.msra.mxu2 %v1374_v25  ;;  %1990 = vst [vmem:[#allocation8_spill] sm:$0xff] %v1426_v41  ;;  %v1451_v46 = vld [vmem:[#allocation3 + $0x40] sm:$0xff]  ;;  %v1463_v48 = vld [vmem:[#allocation3 + $0x10] sm:$0xff]  ;;  %v50_v50 = vld [vmem:[%s1966_s0 + $0x8] sm:$0xff] }
  0x16   :  { %108 = vmatpush.msra.mxu0 %v1356_v20  ;;  %128 = vmatpush.msra.mxu1 %v1358_v21  ;;  %1991 = vst [vmem:[#allocation9_spill] sm:$0xff] %v1428_v42  ;;  %v49_v49 = vld [vmem:[%s1966_s0] sm:$0xff] }
  0x17   :  { %223 = vmatpush.msra.mxu3 %v1356_v20  ;;  %146 = vmatpush.msra.mxu2 %v1384_v28  ;;  %1992 = vst [vmem:[#allocation10_spill] sm:$0xff] %v1457_v47 }
  0x18   :  { %109 = vmatpush.msra.mxu0 %v1366_v23  ;;  %129 = vmatpush.msra.mxu1 %v1368_v24  ;;  %1993 = vst [vmem:[#allocation11_spill] sm:$0xff] %v1463_v48 }
  0x19   :  { %224 = vmatpush.msra.mxu3 %v1366_v23  ;;  %147 = vmatpush.msra.mxu2 %v1394_v31 }
  0x1a   :  { %110 = vmatpush.msra.mxu0 %v1376_v26  ;;  %130 = vmatpush.msra.mxu1 %v1378_v27 }
  0x1b   :  { %225 = vmatpush.msra.mxu3 %v1376_v26  ;;  %148 = vmatpush.msra.mxu2 %v1404_v34 }
  0x1c   :  { %111 = vmatpush.msra.mxu0 %v1386_v29  ;;  %131 = vmatpush.msra.mxu1 %v1388_v30 }
  0x1d   :  { %226 = vmatpush.msra.mxu3 %v1386_v29  ;;  %149 = vmatpush.msra.mxu2 %v1414_v37 }
  0x1e   :  { %112 = vmatpush.msra.mxu0 %v1396_v32  ;;  %132 = vmatpush.msra.mxu1 %v1398_v33 }
  0x1f   :  { %227 = vmatpush.msra.mxu3 %v1396_v32  ;;  %150 = vmatpush.msra.mxu2 %v1424_v40 }
  0x20   :  { %113 = vmatpush.msra.mxu0 %v1406_v35  ;;  %133 = vmatpush.msra.mxu1 %v1408_v36 }
  0x21   :  { %228 = vmatpush.msra.mxu3 %v1406_v35  ;;  %151 = vmatpush.msra.mxu2 %v1440_v44 }
  0x22   :  { %114 = vmatpush.msra.mxu0 %v1416_v38  ;;  %134 = vmatpush.msra.mxu1 %v1418_v39 }
  0x23   :  { %229 = vmatpush.msra.mxu3 %v1416_v38  ;;  %152 = vmatpush.msra.mxu2 %v1447_v45 }
  0x24   :  { %115 = vmatpush.msra.mxu0 %v1426_v41  ;;  %135 = vmatpush.msra.mxu1 %v1428_v42 }
  0x25   :  { %116 = vmatmul.f32.vlgmr.msra.gmra.mxu0 %v1437_v43  ;;  %136 = vmatmul.f32.vlgmr.msra.gmra.mxu1 %v1437_v43 }
  0x26   :  { %235 = vmatpush.msrb.mxu0 %v1296_v1  ;;  %255 = vmatpush.msrb.mxu1 %v1329_v12 }
  0x27   :  { %230 = vmatpush.msra.mxu3 %v1426_v41  ;;  %153 = vmatpush.msra.mxu2 %v1451_v46 }
  0x28   :  { %236 = vmatpush.msrb.mxu0 %v1302_v3  ;;  %256 = vmatpush.msrb.mxu1 %v1334_v13 }
  0x29   :  { %347 = vmatpush.msrb.mxu3 %v1296_v1  ;;  %154 = vmatpush.msra.mxu2 %v1457_v47 }
  0x2a   :  { %237 = vmatpush.msrb.mxu0 %v1306_v5  ;;  %257 = vmatpush.msrb.mxu1 %v1344_v16 }
  0x2b   :  { %348 = vmatpush.msrb.mxu3 %v1302_v3  ;;  %155 = vmatpush.msra.mxu2 %v1463_v48 }
  0x2c   :  { %238 = vmatpush.msrb.mxu0 %v1313_v7  ;;  %258 = vmatpush.msrb.mxu1 %v1354_v19 }
  0x2d   :  { %349 = vmatpush.msrb.mxu3 %v1306_v5  ;;  %156 = vmatmul.f32.vlgmr.msra.gmra.mxu2 %v1437_v43 }
  0x2e   :  { %239 = vmatpush.msrb.mxu0 %v1320_v9  ;;  %259 = vmatpush.msrb.mxu1 %v1364_v22 }
  0x2f   :  { %327 = vmatpush.msrb.mxu2 %v1294_v0  ;;  %350 = vmatpush.msrb.mxu3 %v1313_v7 }
  0x30   :  { %240 = vmatpush.msrb.mxu0 %v1327_v11  ;;  %260 = vmatpush.msrb.mxu1 %v1374_v25 }
  0x31   :  { %328 = vmatpush.msrb.mxu2 %v1298_v2  ;;  %351 = vmatpush.msrb.mxu3 %v1320_v9 }
  0x32   :  { %241 = vmatpush.msrb.mxu0 %v1338_v15  ;;  %261 = vmatpush.msrb.mxu1 %v1384_v28 }
  0x33   :  { %329 = vmatpush.msrb.mxu2 %v1304_v4  ;;  %352 = vmatpush.msrb.mxu3 %v1327_v11 }
  0x34   :  { %242 = vmatpush.msrb.mxu0 %v1348_v18  ;;  %262 = vmatpush.msrb.mxu1 %v1394_v31 }
  0x35   :  { %330 = vmatpush.msrb.mxu2 %v1311_v6  ;;  %353 = vmatpush.msrb.mxu3 %v1338_v15 }
  0x36   :  { %243 = vmatpush.msrb.mxu0 %v1358_v21  ;;  %263 = vmatpush.msrb.mxu1 %v1404_v34 }
  0x37   :  { %331 = vmatpush.msrb.mxu2 %v1318_v8  ;;  %354 = vmatpush.msrb.mxu3 %v1348_v18 }
  0x38   :  { %244 = vmatpush.msrb.mxu0 %v1368_v24  ;;  %264 = vmatpush.msrb.mxu1 %v1414_v37 }
  0x39   :  { %332 = vmatpush.msrb.mxu2 %v1325_v10  ;;  %355 = vmatpush.msrb.mxu3 %v1358_v21 }
  0x3a   :  { %245 = vmatpush.msrb.mxu0 %v1378_v27  ;;  %265 = vmatpush.msrb.mxu1 %v1424_v40 }
  0x3b   :  { %333 = vmatpush.msrb.mxu2 %v1336_v14  ;;  %356 = vmatpush.msrb.mxu3 %v1368_v24 }
  0x3c   :  { %246 = vmatpush.msrb.mxu0 %v1388_v30  ;;  %266 = vmatpush.msrb.mxu1 %v1440_v44 }
  0x3d   :  { %334 = vmatpush.msrb.mxu2 %v1346_v17  ;;  %357 = vmatpush.msrb.mxu3 %v1378_v27 }
  0x3e   :  { %247 = vmatpush.msrb.mxu0 %v1398_v33  ;;  %267 = vmatpush.msrb.mxu1 %v1447_v45 }
  0x3f   :  { %335 = vmatpush.msrb.mxu2 %v1356_v20  ;;  %358 = vmatpush.msrb.mxu3 %v1388_v30 }
  0x40   :  { %248 = vmatpush.msrb.mxu0 %v1408_v36  ;;  %268 = vmatpush.msrb.mxu1 %v1451_v46 }
  0x41   :  { %336 = vmatpush.msrb.mxu2 %v1366_v23  ;;  %359 = vmatpush.msrb.mxu3 %v1398_v33 }
  0x42   :  { %249 = vmatpush.msrb.mxu0 %v1418_v39  ;;  %269 = vmatpush.msrb.mxu1 %v1457_v47 }
  0x43   :  { %337 = vmatpush.msrb.mxu2 %v1376_v26  ;;  %360 = vmatpush.msrb.mxu3 %v1408_v36 }
  0x44   :  { %250 = vmatpush.msrb.mxu0 %v1428_v42  ;;  %270 = vmatpush.msrb.mxu1 %v1463_v48 }
  0x45   :  { %338 = vmatpush.msrb.mxu2 %v1386_v29  ;;  %361 = vmatpush.msrb.mxu3 %v1418_v39 }
  0x46   :  { %367 = vmatpush.msra.mxu0 %v1329_v12  ;;  %439 = vmatpush.msra.mxu1 %v1294_v0 }
  0x47   :  { %339 = vmatpush.msrb.mxu2 %v1396_v32  ;;  %362 = vmatpush.msrb.mxu3 %v1428_v42 }
  0x48   :  { %368 = vmatpush.msra.mxu0 %v1334_v13  ;;  %440 = vmatpush.msra.mxu1 %v1298_v2 }
  0x49   :  { %340 = vmatpush.msrb.mxu2 %v1406_v35 }
  0x4a   :  { %369 = vmatpush.msra.mxu0 %v1344_v16  ;;  %441 = vmatpush.msra.mxu1 %v1304_v4 }
  0x4b   :  { %341 = vmatpush.msrb.mxu2 %v1416_v38 }
  0x4c   :  { %370 = vmatpush.msra.mxu0 %v1354_v19  ;;  %442 = vmatpush.msra.mxu1 %v1311_v6 }
  0x4d   :  { %342 = vmatpush.msrb.mxu2 %v1426_v41 }
  0x4e   :  { %371 = vmatpush.msra.mxu0 %v1364_v22  ;;  %443 = vmatpush.msra.mxu1 %v1318_v8 }
  0x4f   :  { %459 = vmatpush.msra.mxu2 %v1296_v1 }
  0x50   :  { %372 = vmatpush.msra.mxu0 %v1374_v25  ;;  %444 = vmatpush.msra.mxu1 %v1325_v10 }
  0x51   :  { %460 = vmatpush.msra.mxu2 %v1302_v3 }
  0x52   :  { %373 = vmatpush.msra.mxu0 %v1384_v28  ;;  %445 = vmatpush.msra.mxu1 %v1336_v14 }
  0x53   :  { %461 = vmatpush.msra.mxu2 %v1306_v5 }
  0x54   :  { %374 = vmatpush.msra.mxu0 %v1394_v31  ;;  %446 = vmatpush.msra.mxu1 %v1346_v17 }
  0x55   :  { %462 = vmatpush.msra.mxu2 %v1313_v7 }
  0x56   :  { %375 = vmatpush.msra.mxu0 %v1404_v34  ;;  %447 = vmatpush.msra.mxu1 %v1356_v20 }
  0x57   :  { %463 = vmatpush.msra.mxu2 %v1320_v9 }
  0x58   :  { %376 = vmatpush.msra.mxu0 %v1414_v37  ;;  %448 = vmatpush.msra.mxu1 %v1366_v23 }
  0x59   :  { %464 = vmatpush.msra.mxu2 %v1327_v11 }
  0x5a   :  { %377 = vmatpush.msra.mxu0 %v1424_v40  ;;  %449 = vmatpush.msra.mxu1 %v1376_v26 }
  0x5b   :  { %465 = vmatpush.msra.mxu2 %v1338_v15 }
  0x5c   :  { %378 = vmatpush.msra.mxu0 %v1440_v44  ;;  %450 = vmatpush.msra.mxu1 %v1386_v29 }
  0x5d   :  { %466 = vmatpush.msra.mxu2 %v1348_v18 }
  0x5e   :  { %379 = vmatpush.msra.mxu0 %v1447_v45  ;;  %451 = vmatpush.msra.mxu1 %v1396_v32 }
  0x5f   :  { %467 = vmatpush.msra.mxu2 %v1358_v21 }
  0x60   :  { %380 = vmatpush.msra.mxu0 %v1451_v46  ;;  %452 = vmatpush.msra.mxu1 %v1406_v35 }
  0x61   :  { %468 = vmatpush.msra.mxu2 %v1368_v24 }
  0x62   :  { %381 = vmatpush.msra.mxu0 %v1457_v47  ;;  %453 = vmatpush.msra.mxu1 %v1416_v38 }
  0x63   :  { %469 = vmatpush.msra.mxu2 %v1378_v27 }
  0x64   :  { %382 = vmatpush.msra.mxu0 %v1463_v48  ;;  %454 = vmatpush.msra.mxu1 %v1426_v41 }
  0x65   :  { %470 = vmatpush.msra.mxu2 %v1388_v30 }
  0x67   :  { %471 = vmatpush.msra.mxu2 %v1398_v33 }
  0x69   :  { %472 = vmatpush.msra.mxu2 %v1408_v36 }
  0x6b   :  { %473 = vmatpush.msra.mxu2 %v1418_v39 }
  0x6d   :  { %474 = vmatpush.msra.mxu2 %v1428_v42 }
  0xa2   :  { %v117_v51 = vpop.f32.mrf.mxu0  ;;  %v137_v52 = vpop.f32.mrf.mxu1 }
  0xa3   :  { %v160_v53 = vadd.f32 %v117_v51, %v49_v49  ;;  %v180_v54 = vadd.f32 %v137_v52, %v50_v50  ;;  %v1583_v49 = vld [vmem:[%s1969_s3] ss:$0 sm:$0xff] }
  0xa4   :  { %1994 = vst [vmem:[#allocation12_spill] sm:$0xff] %v1583_v49 }
  0xa5   :  { %v1051_v55 = vmul.f32 -1.442695, %v160_v53  ;;  %v1052_v56 = vmul.f32 -1.442695, %v180_v54 }
  0xa7   :  { %1093 = vpow2.f32 %v1051_v55 }
  0xa8   :  { %1095 = vpow2.f32 %v1052_v56 }
  0xad   :  { %v1094_v57 = vpop.eup %1093 }
  0xae   :  { %v1096_v58 = vpop.eup %1095  ;;  %v164_v59 = vadd.f32 1.0, %v1094_v57 }
  0xaf   :  { %v184_v60 = vadd.f32 1.0, %v1096_v58 }
  0xb0   :  { %1097 = vrcp.f32 %v164_v59  ;;  %v157_v51 = vpop.f32.mrf.mxu2  ;;  %v176_v52 = vand.u32 2147483648, %v164_v59  ;;  %v174_v54 = vand.u32 2147483647, %v164_v59  ;;  %vm170_vm1 = vweird.f32 %v164_v59 }
  0xb1   :  { %1099 = vrcp.f32 %v184_v60  ;;  %v203_v57 = vadd.f32 %v1583_v49, %v157_v51  ;;  %vm190_vm4 = vweird.f32 %v184_v60  ;;  %v196_v38 = vand.u32 2147483648, %v184_v60 }
  0xb2   :  { %v177_v58 = vor.u32 1.1754944e-38, %v176_v52  ;;  %vm175_vm3 = vcmp.eq.f32.partialorder %v174_v54, 8.507059e+37  ;;  %v194_v47 = vand.u32 2147483647, %v184_v60 }
  0xb3   :  { %v197_v51 = vor.u32 1.1754944e-38, %v196_v38  ;;  %v1995_v38 = vld [vmem:[#allocation10_spill] sm:$0xff] }
  0xb4   :  { %vm195_vm7 = vcmp.eq.f32.partialorder %v194_v47, 8.507059e+37  ;;  %v1998_v47 = vld [vmem:[#allocation11_spill] sm:$0xff] }
  0xb6   :  { %v1098_v61 = vpop.eup %1097 }
  0xb7   :  { %v1100_v62 = vpop.eup %1099  ;;  %v166_v63 = vmul.f32 %v1098_v61, %v164_v59  ;;  %vm171_vm0 = vweird.f32 %v1098_v61 }
  0xb8   :  { %v186_v42 = vmul.f32 %v1100_v62, %v184_v60  ;;  %vm172_vm2 = vmor %vm170_vm1, %vm171_vm0  ;;  %vm191_vm5 = vweird.f32 %v1100_v62  ;;  %v2000_v60 = vld [vmem:[#allocation9_spill] sm:$0xff] }
  0xb9   :  { %v167_v41 = vsub.f32 1.0, %v166_v63  ;;  %v51_v63 = vld [vmem:[%s1966_s0 + $0x10] sm:$0xff]  ;;  %vm192_vm6 = vmor %vm190_vm4, %vm191_vm5 }
  0xba   :  { %v187_v50 = vsub.f32 1.0, %v186_v42 }
  0xbb   :  { %v168_v53 = vmul.f32 %v1098_v61, %v167_v41 }
  0xbc   :  { %v188_v55 = vmul.f32 %v1100_v62, %v187_v50 }
  0xbd   :  { %v169_v56 = vadd.f32 %v1098_v61, %v168_v53 }
  0xbe   :  { %v189_v39 = vadd.f32 %v1100_v62, %v188_v55 }
  0xbf   :  { %v173_v48 = vsel %vm172_vm2, %v1098_v61, %v169_v56 }
  0xc0   :  { %v178_v42 = vsel %vm175_vm3, %v177_v58, %v173_v48  ;;  %v193_v59 = vsel %vm192_vm6, %v1100_v62, %v189_v39  ;;  %v1996_v39 = vld [vmem:[#allocation6_spill] sm:$0xff]  ;;  %v1999_v48 = vld [vmem:[#allocation8_spill] sm:$0xff] }
  0xc1   :  { %v204_v41 = vmul.f32 %v203_v57, %v178_v42  ;;  %v198_v52 = vsel %vm195_vm7, %v197_v51, %v193_v59  ;;  %v1054_v62 = vld [vmem:[%s1966_s0 + $0x20] sm:$0xff] }
  0xc2   :  { %v207_v61 = vsub.f32 1.0, %v198_v52  ;;  %v209_v56 = vmul.f32 %v198_v52, %v1437_v43  ;;  %v1997_v43 = vld [vmem:[#allocation7_spill] sm:$0xff] }
  0xc3   :  { %v205_v50 = vadd.f32 %v204_v41, %v51_v63  ;;  %v1053_v63 = vld [vmem:[%s1966_s0 + $0x18] sm:$0xff] }
  0xc5   :  { %1101 = vtanh.f32 %v205_v50 }
  0xcb   :  { %v1102_v53 = vpop.eup %1101 }
  0xcc   :  { %v208_v54 = vmul.f32 %v1102_v53, %v207_v61 }
  0xce   :  { %v1590_v49 = vadd.f32 %v209_v56, %v208_v54 }
  0xd0   :  { %231 = vmatmul.f32.vlgmr.msra.gmra.mxu3 %v1590_v49  ;;  %251 = vmatmul.f32.vlgmr.msrb.gmra.mxu0 %v1590_v49 }
  0xd1   :  { %271 = vmatmul.f32.vlgmr.msrb.gmra.mxu1 %v1590_v49  ;;  %479 = vmatpush.msra.mxu3 %v1329_v12 }
  0xd2   :  { %551 = vmatpush.msrb.mxu0 %v1294_v0  ;;  %571 = vmatpush.msrb.mxu1 %v1296_v1 }
  0xd3   :  { %480 = vmatpush.msra.mxu3 %v1334_v13 }
  0xd4   :  { %552 = vmatpush.msrb.mxu0 %v1298_v2  ;;  %572 = vmatpush.msrb.mxu1 %v1302_v3 }
  0xd5   :  { %481 = vmatpush.msra.mxu3 %v1344_v16 }
  0xd6   :  { %553 = vmatpush.msrb.mxu0 %v1304_v4  ;;  %573 = vmatpush.msrb.mxu1 %v1306_v5 }
  0xd7   :  { %482 = vmatpush.msra.mxu3 %v1354_v19 }
  0xd8   :  { %554 = vmatpush.msrb.mxu0 %v1311_v6  ;;  %574 = vmatpush.msrb.mxu1 %v1313_v7 }
  0xd9   :  { %483 = vmatpush.msra.mxu3 %v1364_v22 }
  0xda   :  { %555 = vmatpush.msrb.mxu0 %v1318_v8  ;;  %575 = vmatpush.msrb.mxu1 %v1320_v9 }
  0xdb   :  { %484 = vmatpush.msra.mxu3 %v1374_v25 }
  0xdc   :  { %556 = vmatpush.msrb.mxu0 %v1325_v10  ;;  %576 = vmatpush.msrb.mxu1 %v1327_v11 }
  0xdd   :  { %485 = vmatpush.msra.mxu3 %v1384_v28 }
  0xde   :  { %557 = vmatpush.msrb.mxu0 %v1336_v14  ;;  %577 = vmatpush.msrb.mxu1 %v1338_v15 }
  0xdf   :  { %486 = vmatpush.msra.mxu3 %v1394_v31 }
  0xe0   :  { %558 = vmatpush.msrb.mxu0 %v1346_v17  ;;  %578 = vmatpush.msrb.mxu1 %v1348_v18 }
  0xe1   :  { %487 = vmatpush.msra.mxu3 %v1404_v34 }
  0xe2   :  { %559 = vmatpush.msrb.mxu0 %v1356_v20  ;;  %579 = vmatpush.msrb.mxu1 %v1358_v21 }
  0xe3   :  { %488 = vmatpush.msra.mxu3 %v1414_v37 }
  0xe4   :  { %560 = vmatpush.msrb.mxu0 %v1366_v23  ;;  %580 = vmatpush.msrb.mxu1 %v1368_v24 }
  0xe5   :  { %489 = vmatpush.msra.mxu3 %v1424_v40 }
  0xe6   :  { %561 = vmatpush.msrb.mxu0 %v1376_v26  ;;  %581 = vmatpush.msrb.mxu1 %v1378_v27 }
  0xe7   :  { %490 = vmatpush.msra.mxu3 %v1440_v44 }
  0xe8   :  { %562 = vmatpush.msrb.mxu0 %v1386_v29  ;;  %582 = vmatpush.msrb.mxu1 %v1388_v30 }
  0xe9   :  { %491 = vmatpush.msra.mxu3 %v1447_v45 }
  0xea   :  { %563 = vmatpush.msrb.mxu0 %v1396_v32  ;;  %583 = vmatpush.msrb.mxu1 %v1398_v33 }
  0xeb   :  { %492 = vmatpush.msra.mxu3 %v1451_v46 }
  0xec   :  { %564 = vmatpush.msrb.mxu0 %v1406_v35  ;;  %584 = vmatpush.msrb.mxu1 %v1408_v36 }
  0xed   :  { %493 = vmatpush.msra.mxu3 %v1995_v38 }
  0xee   :  { %565 = vmatpush.msrb.mxu0 %v1996_v39  ;;  %585 = vmatpush.msrb.mxu1 %v1997_v43 }
  0xef   :  { %494 = vmatpush.msra.mxu3 %v1998_v47 }
  0xf0   :  { %566 = vmatpush.msrb.mxu0 %v1999_v48  ;;  %586 = vmatpush.msrb.mxu1 %v2000_v60 }
 0x14d   :  { %v252_v55 = vpop.f32.mrf.mxu0 }
 0x14e   :  { %v295_v57 = vadd.f32 %v1054_v62, %v252_v55 }
 0x150   :  { %v1057_v58 = vmul.f32 -1.442695, %v295_v57 }
 0x152   :  { %1103 = vpow2.f32 %v1057_v58 }
 0x153   :  { %v232_v42 = vpop.f32.mrf.mxu3 }
 0x154   :  { %v275_v41 = vadd.f32 %v1053_v63, %v232_v42  ;;  %v272_v63 = vpop.f32.mrf.mxu1 }
 0x156   :  { %v1056_v50 = vmul.f32 -1.442695, %v275_v41 }
 0x158   :  { %v1104_v59 = vpop.eup %1103  ;;  %1105 = vpow2.f32 %v1056_v50  ;;  %v2001_v50 = vld [vmem:[#allocation12_spill] sm:$0xff] }
 0x159   :  { %v299_v51 = vadd.f32 1.0, %v1104_v59  ;;  %v315_v59 = vadd.f32 %v2001_v50, %v272_v63 }
 0x15b   :  { %1107 = vrcp.f32 %v299_v51  ;;  %vm305_vm13 = vweird.f32 %v299_v51 }
 0x15e   :  { %v1106_v52 = vpop.eup %1105 }
 0x15f   :  { %v279_v61 = vadd.f32 1.0, %v1106_v52 }
 0x161   :  { %1109 = vrcp.f32 %v279_v61  ;;  %v1108_v53 = vpop.eup %1107  ;;  %v291_v60 = vand.u32 2147483648, %v279_v61  ;;  %v289_v58 = vand.u32 2147483647, %v279_v61  ;;  %vm285_vm9 = vweird.f32 %v279_v61 }
 0x162   :  { %v301_v54 = vmul.f32 %v1108_v53, %v299_v51  ;;  %vm306_vm12 = vweird.f32 %v1108_v53 }
 0x163   :  { %v292_v41 = vor.u32 1.1754944e-38, %v291_v60  ;;  %vm290_vm11 = vcmp.eq.f32.partialorder %v289_v58, 8.507059e+37  ;;  %vm307_vm14 = vmor %vm305_vm13, %vm306_vm12 }
 0x164   :  { %v302_v55 = vsub.f32 1.0, %v301_v54  ;;  %v1055_v54 = vld [vmem:[%s1966_s0 + $0x28] sm:$0xff] }
 0x166   :  { %v303_v47 = vmul.f32 %v1108_v53, %v302_v55  ;;  %v309_v55 = vand.u32 2147483647, %v299_v51 }
 0x167   :  { %v1110_v56 = vpop.eup %1109 }
 0x168   :  { %v281_v62 = vmul.f32 %v1110_v56, %v279_v61  ;;  %vm286_vm8 = vweird.f32 %v1110_v56  ;;  %vm310_vm15 = vcmp.eq.f32.partialorder %v309_v55, 8.507059e+37 }
 0x169   :  { %vm287_vm10 = vmor %vm285_vm9, %vm286_vm8 }
 0x16a   :  { %v282_v57 = vsub.f32 1.0, %v281_v62  ;;  %v304_v62 = vadd.f32 %v1108_v53, %v303_v47  ;;  %v2006_v47 = vld [vmem:[#allocation8_spill] sm:$0xff] }
 0x16c   :  { %v283_v48 = vmul.f32 %v1110_v56, %v282_v57  ;;  %v311_v57 = vand.u32 2147483648, %v299_v51  ;;  %v308_v61 = vsel %vm307_vm14, %v1108_v53, %v304_v62  ;;  %v2007_v51 = vld [vmem:[#allocation9_spill] sm:$0xff]  ;;  %v1058_v53 = vld [vmem:[%s1966_s0 + $0x30] sm:$0xff] }
 0x16e   :  { %v284_v42 = vadd.f32 %v1110_v56, %v283_v48  ;;  %v312_v38 = vor.u32 1.1754944e-38, %v311_v57 }
 0x170   :  { %v288_v52 = vsel %vm287_vm10, %v1110_v56, %v284_v42  ;;  %v313_v60 = vsel %vm310_vm15, %v312_v38, %v308_v61  ;;  %v2003_v38 = vld [vmem:[#allocation6_spill] sm:$0xff] }
 0x171   :  { %v293_v43 = vsel %vm290_vm11, %v292_v41, %v288_v52  ;;  %v319_v56 = vsub.f32 1.0, %v313_v60  ;;  %v321_v42 = vmul.f32 %v313_v60, %v1590_v49  ;;  %v2002_v49 = vld [vmem:[#allocation10_spill] sm:$0xff] }
 0x172   :  { %v316_v39 = vmul.f32 %v315_v59, %v293_v43  ;;  %v2005_v43 = vld [vmem:[#allocation11_spill] sm:$0xff]  ;;  %v1059_v59 = vld [vmem:[%s1966_s0 + $0x38] sm:$0xff] }
 0x174   :  { %v317_v48 = vadd.f32 %v1055_v54, %v316_v39  ;;  %v2004_v39 = vld [vmem:[#allocation7_spill] sm:$0xff] }
 0x176   :  { %1111 = vtanh.f32 %v317_v48 }
 0x17c   :  { %v1112_v58 = vpop.eup %1111 }
 0x17d   :  { %v320_v63 = vmul.f32 %v1112_v58, %v319_v56 }
 0x17f   :  { %v1654_v41 = vadd.f32 %v321_v42, %v320_v63 }
 0x181   :  { %343 = vmatmul.f32.vlgmr.msrb.gmra.mxu2 %v1654_v41  ;;  %363 = vmatmul.f32.vlgmr.msrb.gmra.mxu3 %v1654_v41 }
 0x182   :  { %383 = vmatmul.f32.vlgmr.msra.gmra.mxu0 %v1654_v41  ;;  %591 = vmatpush.msrb.mxu2 %v1329_v12 }
 0x183   :  { %663 = vmatpush.msrb.mxu3 %v1294_v0  ;;  %683 = vmatpush.msra.mxu0 %v1296_v1 }
 0x184   :  { %592 = vmatpush.msrb.mxu2 %v1334_v13 }
 0x185   :  { %664 = vmatpush.msrb.mxu3 %v1298_v2  ;;  %684 = vmatpush.msra.mxu0 %v1302_v3 }
 0x186   :  { %593 = vmatpush.msrb.mxu2 %v1344_v16 }
 0x187   :  { %665 = vmatpush.msrb.mxu3 %v1304_v4  ;;  %685 = vmatpush.msra.mxu0 %v1306_v5 }
 0x188   :  { %594 = vmatpush.msrb.mxu2 %v1354_v19 }
 0x189   :  { %666 = vmatpush.msrb.mxu3 %v1311_v6  ;;  %686 = vmatpush.msra.mxu0 %v1313_v7 }
 0x18a   :  { %595 = vmatpush.msrb.mxu2 %v1364_v22 }
 0x18b   :  { %667 = vmatpush.msrb.mxu3 %v1318_v8  ;;  %687 = vmatpush.msra.mxu0 %v1320_v9 }
 0x18c   :  { %596 = vmatpush.msrb.mxu2 %v1374_v25 }
 0x18d   :  { %668 = vmatpush.msrb.mxu3 %v1325_v10  ;;  %688 = vmatpush.msra.mxu0 %v1327_v11 }
 0x18e   :  { %597 = vmatpush.msrb.mxu2 %v1384_v28 }
 0x18f   :  { %669 = vmatpush.msrb.mxu3 %v1336_v14  ;;  %689 = vmatpush.msra.mxu0 %v1338_v15 }
 0x190   :  { %598 = vmatpush.msrb.mxu2 %v1394_v31 }
 0x191   :  { %670 = vmatpush.msrb.mxu3 %v1346_v17  ;;  %690 = vmatpush.msra.mxu0 %v1348_v18 }
 0x192   :  { %599 = vmatpush.msrb.mxu2 %v1404_v34 }
 0x193   :  { %671 = vmatpush.msrb.mxu3 %v1356_v20  ;;  %691 = vmatpush.msra.mxu0 %v1358_v21 }
 0x194   :  { %600 = vmatpush.msrb.mxu2 %v1414_v37 }
 0x195   :  { %672 = vmatpush.msrb.mxu3 %v1366_v23  ;;  %692 = vmatpush.msra.mxu0 %v1368_v24 }
 0x196   :  { %601 = vmatpush.msrb.mxu2 %v1424_v40 }
 0x197   :  { %673 = vmatpush.msrb.mxu3 %v1376_v26  ;;  %693 = vmatpush.msra.mxu0 %v1378_v27 }
 0x198   :  { %602 = vmatpush.msrb.mxu2 %v1440_v44 }
 0x199   :  { %674 = vmatpush.msrb.mxu3 %v1386_v29  ;;  %694 = vmatpush.msra.mxu0 %v1388_v30 }
 0x19a   :  { %603 = vmatpush.msrb.mxu2 %v1447_v45 }
 0x19b   :  { %675 = vmatpush.msrb.mxu3 %v1396_v32  ;;  %695 = vmatpush.msra.mxu0 %v1398_v33 }
 0x19c   :  { %604 = vmatpush.msrb.mxu2 %v1451_v46 }
 0x19d   :  { %676 = vmatpush.msrb.mxu3 %v1406_v35  ;;  %696 = vmatpush.msra.mxu0 %v1408_v36 }
 0x19e   :  { %605 = vmatpush.msrb.mxu2 %v2002_v49 }
 0x19f   :  { %677 = vmatpush.msrb.mxu3 %v2003_v38  ;;  %697 = vmatpush.msra.mxu0 %v2004_v39 }
 0x1a0   :  { %606 = vmatpush.msrb.mxu2 %v2005_v43 }
 0x1a1   :  { %678 = vmatpush.msrb.mxu3 %v2006_v47  ;;  %698 = vmatpush.msra.mxu0 %v2007_v51 }
 0x204   :  { %v344_v52 = vpop.f32.mrf.mxu2  ;;  %v364_v54 = vpop.f32.mrf.mxu3 }
 0x205   :  { %v387_v62 = vadd.f32 %v1058_v53, %v344_v52  ;;  %v407_v57 = vadd.f32 %v1059_v59, %v364_v54  ;;  %v384_v59 = vpop.f32.mrf.mxu0 }
 0x207   :  { %v1061_v55 = vmul.f32 -1.442695, %v387_v62  ;;  %v1062_v48 = vmul.f32 -1.442695, %v407_v57  ;;  %v427_v57 = vadd.f32 %v2001_v50, %v384_v59 }
 0x209   :  { %1113 = vpow2.f32 %v1061_v55 }
 0x20a   :  { %1115 = vpow2.f32 %v1062_v48 }
 0x20f   :  { %v1114_v61 = vpop.eup %1113 }
 0x210   :  { %v1116_v60 = vpop.eup %1115  ;;  %v391_v56 = vadd.f32 1.0, %v1114_v61 }
 0x211   :  { %v411_v58 = vadd.f32 1.0, %v1116_v60 }
 0x212   :  { %1117 = vrcp.f32 %v391_v56  ;;  %v403_v39 = vand.u32 2147483648, %v391_v56  ;;  %v401_v53 = vand.u32 2147483647, %v391_v56  ;;  %vm397_vm1 = vweird.f32 %v391_v56 }
 0x213   :  { %1119 = vrcp.f32 %v411_v58  ;;  %vm417_vm5 = vweird.f32 %v411_v58  ;;  %v421_v60 = vand.u32 2147483647, %v411_v58 }
 0x214   :  { %v404_v62 = vor.u32 1.1754944e-38, %v403_v39  ;;  %vm402_vm3 = vcmp.eq.f32.partialorder %v401_v53, 8.507059e+37 }
 0x215   :  { %vm422_vm7 = vcmp.eq.f32.partialorder %v421_v60, 8.507059e+37  ;;  %v1178_v60 = vld [vmem:[#allocation3 + $0x158] sm:$0xff] }
 0x218   :  { %v1118_v63 = vpop.eup %1117 }
 0x219   :  { %v1120_v42 = vpop.eup %1119  ;;  %v393_v51 = vmul.f32 %v1118_v63, %v391_v56  ;;  %vm398_vm0 = vweird.f32 %v1118_v63 }
 0x21a   :  { %v413_v47 = vmul.f32 %v1120_v42, %v411_v58  ;;  %vm399_vm2 = vmor %vm397_vm1, %vm398_vm0  ;;  %vm418_vm4 = vweird.f32 %v1120_v42 }
 0x21b   :  { %v394_v43 = vsub.f32 1.0, %v393_v51  ;;  %v1060_v51 = vld [vmem:[%s1966_s0 + $0x40] sm:$0xff]  ;;  %vm419_vm6 = vmor %vm417_vm5, %vm418_vm4 }
 0x21c   :  { %v414_v38 = vsub.f32 1.0, %v413_v47 }
 0x21d   :  { %v395_v49 = vmul.f32 %v1118_v63, %v394_v43  ;;  %v423_v43 = vand.u32 2147483648, %v411_v58 }
 0x21e   :  { %v415_v52 = vmul.f32 %v1120_v42, %v414_v38 }
 0x21f   :  { %v396_v54 = vadd.f32 %v1118_v63, %v395_v49  ;;  %v424_v56 = vor.u32 1.1754944e-38, %v423_v43  ;;  %v1790_v43 = vld [vmem:[#allocation3 + $0x160] sm:$0xff] }
 0x220   :  { %v416_v61 = vadd.f32 %v1120_v42, %v415_v52 }
 0x221   :  { %v400_v55 = vsel %vm399_vm2, %v1118_v63, %v396_v54 }
 0x222   :  { %v405_v48 = vsel %vm402_vm3, %v404_v62, %v400_v55  ;;  %v420_v38 = vsel %vm419_vm6, %v1120_v42, %v416_v61  ;;  %v1175_v61 = vld [vmem:[#allocation3 + $0x170] sm:$0xff] }
 0x223   :  { %v428_v47 = vmul.f32 %v427_v57, %v405_v48  ;;  %v425_v39 = vsel %vm422_vm7, %v424_v56, %v420_v38  ;;  %v1787_v48 = vld [vmem:[#allocation3 + $0x178] sm:$0xff]  ;;  %v1181_v56 = vld [vmem:[#allocation3 + $0x140] sm:$0xff] }
 0x224   :  { %v431_v63 = vsub.f32 1.0, %v425_v39  ;;  %v433_v54 = vmul.f32 %v425_v39, %v1654_v41  ;;  %v1180_v38 = vld [vmem:[#allocation3 + $0x138] sm:$0xff]  ;;  %v1796_v39 = vld [vmem:[#allocation3 + $0x130] sm:$0xff] }
 0x225   :  { %v429_v49 = vadd.f32 %v1060_v51, %v428_v47  ;;  %v1174_v51 = vld [vmem:[#allocation3 + $0x168] sm:$0xff]  ;;  %v1177_v47 = vld [vmem:[#allocation3 + $0x150] sm:$0xff] }
 0x227   :  { %1121 = vtanh.f32 %v429_v49  ;;  %v1793_v49 = vld [vmem:[#allocation3 + $0x148] sm:$0xff] }
 0x22d   :  { %v1122_v53 = vpop.eup %1121 }
 0x22e   :  { %v432_v59 = vmul.f32 %v1122_v53, %v431_v63  ;;  %v1183_v63 = vld [vmem:[#allocation3 + $0x120] sm:$0xff]  ;;  %v1184_v53 = vld [vmem:[#allocation3 + $0x128] sm:$0xff] }
 0x230   :  { %v1718_v62 = vadd.f32 %v433_v54, %v432_v59  ;;  %v1799_v59 = vld [vmem:[#allocation3 + $0x118] sm:$0xff]  ;;  %v1186_v54 = vld [vmem:[#allocation3 + $0x108] sm:$0xff] }
 0x232   :  { %455 = vmatmul.f32.vlgmr.msra.gmra.mxu1 %v1718_v62  ;;  %475 = vmatmul.f32.vlgmr.msra.gmra.mxu2 %v1718_v62 }
 0x233   :  { %495 = vmatmul.f32.vlgmr.msra.gmra.mxu3 %v1718_v62  ;;  %703 = vmatpush.msra.mxu1 %v1329_v12 }
 0x234   :  { %775 = vmatpush.msra.mxu2 %v1294_v0  ;;  %795 = vmatpush.msra.mxu3 %v1296_v1  ;;  %v2008_v0 = vld [vmem:[#allocation10_spill] sm:$0xff] }
 0x235   :  { %704 = vmatpush.msra.mxu1 %v1334_v13  ;;  %v2009_v1 = vld [vmem:[#allocation6_spill] sm:$0xff] }
 0x236   :  { %776 = vmatpush.msra.mxu2 %v1298_v2  ;;  %796 = vmatpush.msra.mxu3 %v1302_v3  ;;  %v2010_v2 = vld [vmem:[#allocation7_spill] sm:$0xff] }
 0x237   :  { %705 = vmatpush.msra.mxu1 %v1344_v16  ;;  %v2011_v3 = vld [vmem:[#allocation11_spill] sm:$0xff] }
 0x238   :  { %777 = vmatpush.msra.mxu2 %v1304_v4  ;;  %797 = vmatpush.msra.mxu3 %v1306_v5  ;;  %v2012_v4 = vld [vmem:[#allocation8_spill] sm:$0xff]  ;;  %v2013_v5 = vld [vmem:[#allocation9_spill] sm:$0xff] }
 0x239   :  { %706 = vmatpush.msra.mxu1 %v1354_v19 }
 0x23a   :  { %778 = vmatpush.msra.mxu2 %v1311_v6  ;;  %798 = vmatpush.msra.mxu3 %v1313_v7  ;;  %v1063_v6 = vld [vmem:[%s1966_s0 + $0x48] sm:$0xff] }
 0x23b   :  { %707 = vmatpush.msra.mxu1 %v1364_v22 }
 0x23c   :  { %779 = vmatpush.msra.mxu2 %v1318_v8  ;;  %799 = vmatpush.msra.mxu3 %v1320_v9 }
 0x23d   :  { %708 = vmatpush.msra.mxu1 %v1374_v25 }
 0x23e   :  { %780 = vmatpush.msra.mxu2 %v1325_v10  ;;  %800 = vmatpush.msra.mxu3 %v1327_v11  ;;  %v1064_v10 = vld [vmem:[%s1966_s0 + $0x50] sm:$0xff] }
 0x23f   :  { %709 = vmatpush.msra.mxu1 %v1384_v28 }
 0x240   :  { %781 = vmatpush.msra.mxu2 %v1336_v14  ;;  %801 = vmatpush.msra.mxu3 %v1338_v15 }
 0x241   :  { %710 = vmatpush.msra.mxu1 %v1394_v31 }
 0x242   :  { %782 = vmatpush.msra.mxu2 %v1346_v17  ;;  %802 = vmatpush.msra.mxu3 %v1348_v18 }
 0x243   :  { %711 = vmatpush.msra.mxu1 %v1404_v34 }
 0x244   :  { %783 = vmatpush.msra.mxu2 %v1356_v20  ;;  %803 = vmatpush.msra.mxu3 %v1358_v21 }
 0x245   :  { %712 = vmatpush.msra.mxu1 %v1414_v37 }
 0x246   :  { %784 = vmatpush.msra.mxu2 %v1366_v23  ;;  %804 = vmatpush.msra.mxu3 %v1368_v24 }
 0x247   :  { %713 = vmatpush.msra.mxu1 %v1424_v40 }
 0x248   :  { %785 = vmatpush.msra.mxu2 %v1376_v26  ;;  %805 = vmatpush.msra.mxu3 %v1378_v27 }
 0x249   :  { %714 = vmatpush.msra.mxu1 %v1440_v44 }
 0x24a   :  { %786 = vmatpush.msra.mxu2 %v1386_v29  ;;  %806 = vmatpush.msra.mxu3 %v1388_v30 }
 0x24b   :  { %715 = vmatpush.msra.mxu1 %v1447_v45 }
 0x24c   :  { %787 = vmatpush.msra.mxu2 %v1396_v32  ;;  %807 = vmatpush.msra.mxu3 %v1398_v33  ;;  %v1065_v32 = vld [vmem:[%s1966_s0 + $0x58] sm:$0xff] }
 0x24d   :  { %716 = vmatpush.msra.mxu1 %v1451_v46 }
 0x24e   :  { %788 = vmatpush.msra.mxu2 %v1406_v35  ;;  %808 = vmatpush.msra.mxu3 %v1408_v36 }
 0x24f   :  { %717 = vmatpush.msra.mxu1 %v2008_v0  ;;  %v1802_v0 = vld [vmem:[#allocation3 + $0x100] sm:$0xff] }
 0x250   :  { %789 = vmatpush.msra.mxu2 %v2009_v1  ;;  %809 = vmatpush.msra.mxu3 %v2010_v2  ;;  %v1189_v1 = vld [vmem:[#allocation3 + $0xf0] sm:$0xff]  ;;  %v1190_v2 = vld [vmem:[#allocation3 + $0xf8] sm:$0xff] }
 0x251   :  { %718 = vmatpush.msra.mxu1 %v2011_v3  ;;  %v1805_v3 = vld [vmem:[#allocation3 + $0xe8] sm:$0xff] }
 0x252   :  { %790 = vmatpush.msra.mxu2 %v2012_v4  ;;  %810 = vmatpush.msra.mxu3 %v2013_v5  ;;  %v1192_v4 = vld [vmem:[#allocation3 + $0xd8] sm:$0xff]  ;;  %v1193_v5 = vld [vmem:[#allocation3 + $0xe0] sm:$0xff] }
 0x2af   :  { %v456_v7 = vpop.f32.mrf.mxu1 }
 0x2b0   :  { %v499_v8 = vadd.f32 %v1063_v6, %v456_v7  ;;  %v1808_v6 = vld [vmem:[#allocation3 + $0xd0] sm:$0xff]  ;;  %v1195_v7 = vld [vmem:[#allocation3 + $0xc0] sm:$0xff] }
 0x2b2   :  { %v1066_v9 = vmul.f32 -1.442695, %v499_v8  ;;  %v1196_v8 = vld [vmem:[#allocation3 + $0xc8] sm:$0xff] }
 0x2b4   :  { %1123 = vpow2.f32 %v1066_v9  ;;  %v1811_v9 = vld [vmem:[#allocation3 + $0xb8] sm:$0xff] }
 0x2b5   :  { %v476_v11 = vpop.f32.mrf.mxu2 }
 0x2b6   :  { %v519_v12 = vadd.f32 %v1064_v10, %v476_v11  ;;  %v496_v25 = vpop.f32.mrf.mxu3  ;;  %v1198_v10 = vld [vmem:[#allocation3 + $0xa8] sm:$0xff]  ;;  %v1199_v11 = vld [vmem:[#allocation3 + $0xb0] sm:$0xff] }
 0x2b7   :  { %v539_v31 = vadd.f32 %v2001_v50, %v496_v25  ;;  %v1213_v25 = vld [vmem:[#allocation3 + $0x30] sm:$0xff] }
 0x2b8   :  { %v1067_v13 = vmul.f32 -1.442695, %v519_v12  ;;  %v1814_v12 = vld [vmem:[#allocation3 + $0xa0] sm:$0xff] }
 0x2ba   :  { %v1124_v14 = vpop.eup %1123  ;;  %1125 = vpow2.f32 %v1067_v13  ;;  %v1201_v13 = vld [vmem:[#allocation3 + $0x90] sm:$0xff] }
 0x2bb   :  { %v503_v15 = vadd.f32 1.0, %v1124_v14  ;;  %v1202_v14 = vld [vmem:[#allocation3 + $0x98] sm:$0xff] }
 0x2bd   :  { %1127 = vrcp.f32 %v503_v15  ;;  %v515_v21 = vand.u32 2147483648, %v503_v15  ;;  %v513_v23 = vand.u32 2147483647, %v503_v15  ;;  %vm509_vm9 = vweird.f32 %v503_v15 }
 0x2bf   :  { %v516_v28 = vor.u32 1.1754944e-38, %v515_v21  ;;  %vm514_vm11 = vcmp.eq.f32.partialorder %v513_v23, 8.507059e+37  ;;  %v1823_v21 = vld [vmem:[#allocation3 + $0x58] sm:$0xff]  ;;  %v1211_v23 = vld [vmem:[#allocation3 + $0x50] sm:$0xff] }
 0x2c0   :  { %v1126_v16 = vpop.eup %1125 }
 0x2c1   :  { %v523_v17 = vadd.f32 1.0, %v1126_v16  ;;  %v1204_v16 = vld [vmem:[#allocation3 + $0x78] sm:$0xff] }
 0x2c3   :  { %v1128_v18 = vpop.eup %1127  ;;  %1129 = vrcp.f32 %v523_v17  ;;  %v535_v36 = vand.u32 2147483648, %v523_v17  ;;  %v533_v37 = vand.u32 2147483647, %v523_v17  ;;  %vm529_vm13 = vweird.f32 %v523_v17 }
 0x2c4   :  { %v505_v19 = vmul.f32 %v1128_v18, %v503_v15  ;;  %vm510_vm8 = vweird.f32 %v1128_v18  ;;  %v1817_v15 = vld [vmem:[#allocation3 + $0x88] sm:$0xff] }
 0x2c5   :  { %vm511_vm10 = vmor %vm509_vm9, %vm510_vm8  ;;  %v536_v46 = vor.u32 1.1754944e-38, %v535_v36  ;;  %vm534_vm15 = vcmp.eq.f32.partialorder %v533_v37, 8.507059e+37 }
 0x2c6   :  { %v506_v20 = vsub.f32 1.0, %v505_v19  ;;  %v1207_v19 = vld [vmem:[#allocation3 + $0x60] sm:$0xff] }
 0x2c8   :  { %v507_v22 = vmul.f32 %v1128_v18, %v506_v20  ;;  %v1208_v20 = vld [vmem:[#allocation3 + $0x68] sm:$0xff] }
 0x2c9   :  { %v1130_v24 = vpop.eup %1129 }
 0x2ca   :  { %v525_v26 = vmul.f32 %v1130_v24, %v523_v17  ;;  %v508_v27 = vadd.f32 %v1128_v18, %v507_v22  ;;  %vm530_vm12 = vweird.f32 %v1130_v24  ;;  %v1205_v17 = vld [vmem:[#allocation3 + $0x80] sm:$0xff]  ;;  %v1210_v22 = vld [vmem:[#allocation3 + $0x48] sm:$0xff] }
 0x2cb   :  { %vm531_vm14 = vmor %vm529_vm13, %vm530_vm12 }
 0x2cc   :  { %v526_v29 = vsub.f32 1.0, %v525_v26  ;;  %v512_v30 = vsel %vm511_vm10, %v1128_v18, %v508_v27  ;;  %v1820_v18 = vld [vmem:[#allocation3 + $0x70] sm:$0xff]  ;;  %v1214_v26 = vld [vmem:[#allocation3 + $0x38] sm:$0xff]  ;;  %v1829_v27 = vld [vmem:[#allocation3 + $0x28] sm:$0xff] }
 0x2cd   :  { %v517_v33 = vsel %vm514_vm11, %v516_v28, %v512_v30  ;;  %v1216_v28 = vld [vmem:[#allocation3 + $0x18] sm:$0xff]  ;;  %v1832_v30 = vld [vmem:[#allocation3 + $0x10] sm:$0xff] }
 0x2ce   :  { %v527_v34 = vmul.f32 %v1130_v24, %v526_v29  ;;  %v540_v35 = vmul.f32 %v539_v31, %v517_v33  ;;  %v1217_v29 = vld [vmem:[#allocation3 + $0x20] sm:$0xff] }
 0x2cf   :  { %v1219_v31 = vld [vmem:[#allocation3] sm:$0xff] }
 0x2d0   :  { %v541_v40 = vadd.f32 %v1065_v32, %v540_v35  ;;  %v528_v44 = vadd.f32 %v1130_v24, %v527_v34  ;;  %v1220_v32 = vld [vmem:[#allocation3 + $0x8] sm:$0xff]  ;;  %v1068_v33 = vld [vmem:[%s1966_s0 + $0x60] sm:$0xff] }
 0x2d1   :  { %v1069_v34 = vld [vmem:[%s1966_s0 + $0x68] sm:$0xff] }
 0x2d2   :  { %1131 = vtanh.f32 %v541_v40  ;;  %v532_v45 = vsel %vm531_vm14, %v1130_v24, %v528_v44  ;;  %v1826_v24 = vld [vmem:[#allocation3 + $0x40] sm:$0xff] }
 0x2d3   :  { %v537_v41 = vsel %vm534_vm15, %v536_v46, %v532_v45 }
 0x2d4   :  { %v543_v58 = vsub.f32 1.0, %v537_v41  ;;  %v545_v57 = vmul.f32 %v537_v41, %v1718_v62  ;;  %v1187_v62 = vld [vmem:[#allocation3 + $0x110] sm:$0xff] }
 0x2d8   :  { %v1132_v42 = vpop.eup %1131 }
 0x2d9   :  { %v544_v52 = vmul.f32 %v1132_v42, %v543_v58 }
 0x2db   :  { %v1782_v55 = vadd.f32 %v545_v57, %v544_v52 }
 0x2dd   :  { %567 = vmatmul.f32.vlgmr.msrb.gmra.mxu0 %v1782_v55  ;;  %587 = vmatmul.f32.vlgmr.msrb.gmra.mxu1 %v1782_v55 }
 0x2de   :  { %607 = vmatmul.f32.vlgmr.msrb.gmra.mxu2 %v1782_v55  ;;  %815 = vmatpush.msrb.mxu0 %v1787_v48 }
 0x2df   :  { %887 = vmatpush.msrb.mxu1 %v1174_v51  ;;  %907 = vmatpush.msrb.mxu2 %v1175_v61 }
 0x2e0   :  { %816 = vmatpush.msrb.mxu0 %v1790_v43 }
 0x2e1   :  { %888 = vmatpush.msrb.mxu1 %v1177_v47  ;;  %908 = vmatpush.msrb.mxu2 %v1178_v60 }
 0x2e2   :  { %817 = vmatpush.msrb.mxu0 %v1793_v49 }
 0x2e3   :  { %889 = vmatpush.msrb.mxu1 %v1180_v38  ;;  %909 = vmatpush.msrb.mxu2 %v1181_v56 }
 0x2e4   :  { %818 = vmatpush.msrb.mxu0 %v1796_v39 }
 0x2e5   :  { %890 = vmatpush.msrb.mxu1 %v1183_v63  ;;  %910 = vmatpush.msrb.mxu2 %v1184_v53 }
 0x2e6   :  { %819 = vmatpush.msrb.mxu0 %v1799_v59 }
 0x2e7   :  { %891 = vmatpush.msrb.mxu1 %v1186_v54  ;;  %911 = vmatpush.msrb.mxu2 %v1187_v62 }
 0x2e8   :  { %820 = vmatpush.msrb.mxu0 %v1802_v0 }
 0x2e9   :  { %892 = vmatpush.msrb.mxu1 %v1189_v1  ;;  %912 = vmatpush.msrb.mxu2 %v1190_v2 }
 0x2ea   :  { %821 = vmatpush.msrb.mxu0 %v1805_v3 }
 0x2eb   :  { %893 = vmatpush.msrb.mxu1 %v1192_v4  ;;  %913 = vmatpush.msrb.mxu2 %v1193_v5  ;;  %v1070_v5 = vld [vmem:[%s1966_s0 + $0x70] sm:$0xff] }
 0x2ec   :  { %822 = vmatpush.msrb.mxu0 %v1808_v6 }
 0x2ed   :  { %894 = vmatpush.msrb.mxu1 %v1195_v7  ;;  %914 = vmatpush.msrb.mxu2 %v1196_v8 }
 0x2ee   :  { %823 = vmatpush.msrb.mxu0 %v1811_v9 }
 0x2ef   :  { %895 = vmatpush.msrb.mxu1 %v1198_v10  ;;  %915 = vmatpush.msrb.mxu2 %v1199_v11 }
 0x2f0   :  { %824 = vmatpush.msrb.mxu0 %v1814_v12 }
 0x2f1   :  { %896 = vmatpush.msrb.mxu1 %v1201_v13  ;;  %916 = vmatpush.msrb.mxu2 %v1202_v14 }
 0x2f2   :  { %825 = vmatpush.msrb.mxu0 %v1817_v15 }
 0x2f3   :  { %897 = vmatpush.msrb.mxu1 %v1204_v16  ;;  %917 = vmatpush.msrb.mxu2 %v1205_v17 }
 0x2f4   :  { %826 = vmatpush.msrb.mxu0 %v1820_v18 }
 0x2f5   :  { %898 = vmatpush.msrb.mxu1 %v1207_v19  ;;  %918 = vmatpush.msrb.mxu2 %v1208_v20 }
 0x2f6   :  { %827 = vmatpush.msrb.mxu0 %v1823_v21 }
 0x2f7   :  { %899 = vmatpush.msrb.mxu1 %v1210_v22  ;;  %919 = vmatpush.msrb.mxu2 %v1211_v23 }
 0x2f8   :  { %828 = vmatpush.msrb.mxu0 %v1826_v24 }
 0x2f9   :  { %900 = vmatpush.msrb.mxu1 %v1213_v25  ;;  %920 = vmatpush.msrb.mxu2 %v1214_v26 }
 0x2fa   :  { %829 = vmatpush.msrb.mxu0 %v1829_v27 }
 0x2fb   :  { %901 = vmatpush.msrb.mxu1 %v1216_v28  ;;  %921 = vmatpush.msrb.mxu2 %v1217_v29 }
 0x2fc   :  { %830 = vmatpush.msrb.mxu0 %v1832_v30 }
 0x2fd   :  { %902 = vmatpush.msrb.mxu1 %v1219_v31  ;;  %922 = vmatpush.msrb.mxu2 %v1220_v32 }
 0x35a   :  { %v568_v35 = vpop.f32.mrf.mxu0  ;;  %v588_v36 = vpop.f32.mrf.mxu1 }
 0x35b   :  { %v611_v37 = vadd.f32 %v1068_v33, %v568_v35  ;;  %v631_v40 = vadd.f32 %v1069_v34, %v588_v36 }
 0x35d   :  { %v1071_v44 = vmul.f32 -1.442695, %v611_v37  ;;  %v1072_v45 = vmul.f32 -1.442695, %v631_v40 }
 0x35f   :  { %1133 = vpow2.f32 %v1071_v44 }
 0x360   :  { %1135 = vpow2.f32 %v1072_v45  ;;  %v1075_v45 = vld [vmem:[%s1966_s0 + $0x88] sm:$0xff] }
 0x361   :  { %v608_v54 = vpop.f32.mrf.mxu2 }
 0x362   :  { %v651_v4 = vadd.f32 %v2001_v50, %v608_v54 }
 0x365   :  { %v1134_v46 = vpop.eup %1133 }
 0x366   :  { %v1136_v41 = vpop.eup %1135  ;;  %v615_v58 = vadd.f32 1.0, %v1134_v46 }
 0x367   :  { %v635_v42 = vadd.f32 1.0, %v1136_v41 }
 0x368   :  { %1137 = vrcp.f32 %v615_v58  ;;  %v627_v38 = vand.u32 2147483648, %v615_v58  ;;  %v625_v63 = vand.u32 2147483647, %v615_v58  ;;  %vm621_vm1 = vweird.f32 %v615_v58 }
 0x369   :  { %1139 = vrcp.f32 %v635_v42  ;;  %v647_v11 = vand.u32 2147483648, %v635_v42  ;;  %vm641_vm5 = vweird.f32 %v635_v42  ;;  %v645_v13 = vand.u32 2147483647, %v635_v42 }
 0x36a   :  { %v628_v1 = vor.u32 1.1754944e-38, %v627_v38  ;;  %vm626_vm3 = vcmp.eq.f32.partialorder %v625_v63, 8.507059e+37  ;;  %v1078_v63 = vld [vmem:[%s1966_s0 + $0x90] sm:$0xff] }
 0x36b   :  { %v648_v17 = vor.u32 1.1754944e-38, %v647_v11  ;;  %vm646_vm7 = vcmp.eq.f32.partialorder %v645_v13, 8.507059e+37 }
 0x36e   :  { %v1138_v52 = vpop.eup %1137 }
 0x36f   :  { %v1140_v57 = vpop.eup %1139  ;;  %v617_v51 = vmul.f32 %v1138_v52, %v615_v58  ;;  %vm622_vm0 = vweird.f32 %v1138_v52 }
 0x370   :  { %v637_v61 = vmul.f32 %v1140_v57, %v635_v42  ;;  %vm623_vm2 = vmor %vm621_vm1, %vm622_vm0  ;;  %vm642_vm4 = vweird.f32 %v1140_v57 }
 0x371   :  { %v618_v47 = vsub.f32 1.0, %v617_v51  ;;  %vm643_vm6 = vmor %vm641_vm5, %vm642_vm4 }
 0x372   :  { %v638_v60 = vsub.f32 1.0, %v637_v61 }
 0x373   :  { %v619_v56 = vmul.f32 %v1138_v52, %v618_v47 }
 0x374   :  { %v639_v53 = vmul.f32 %v1140_v57, %v638_v60 }
 0x375   :  { %v620_v62 = vadd.f32 %v1138_v52, %v619_v56 }
 0x376   :  { %v640_v8 = vadd.f32 %v1140_v57, %v639_v53  ;;  %v1079_v53 = vld [vmem:[%s1966_s0 + $0x98] sm:$0xff] }
 0x377   :  { %v624_v2 = vsel %vm623_vm2, %v1138_v52, %v620_v62 }
 0x378   :  { %v629_v7 = vsel %vm626_vm3, %v628_v1, %v624_v2  ;;  %v644_v16 = vsel %vm643_vm6, %v1140_v57, %v640_v8 }
 0x379   :  { %v652_v10 = vmul.f32 %v651_v4, %v629_v7  ;;  %v649_v19 = vsel %vm646_vm7, %v648_v17, %v644_v16 }
 0x37a   :  { %v655_v20 = vsub.f32 1.0, %v649_v19  ;;  %v657_v25 = vmul.f32 %v649_v19, %v1782_v55  ;;  %v1074_v55 = vld [vmem:[%s1966_s0 + $0x80] sm:$0xff] }
 0x37b   :  { %v653_v14 = vadd.f32 %v1070_v5, %v652_v10 }
 0x37d   :  { %1141 = vtanh.f32 %v653_v14 }
 0x383   :  { %v1142_v22 = vpop.eup %1141 }
 0x384   :  { %v656_v23 = vmul.f32 %v1142_v22, %v655_v20 }
 0x386   :  { %v1846_v26 = vadd.f32 %v657_v25, %v656_v23 }
 0x388   :  { %679 = vmatmul.f32.vlgmr.msrb.gmra.mxu3 %v1846_v26  ;;  %699 = vmatmul.f32.vlgmr.msra.gmra.mxu0 %v1846_v26 }
 0x389   :  { %719 = vmatmul.f32.vlgmr.msra.gmra.mxu1 %v1846_v26  ;;  %927 = vmatpush.msrb.mxu3 %v1787_v48 }
 0x38b   :  { %928 = vmatpush.msrb.mxu3 %v1790_v43 }
 0x38d   :  { %929 = vmatpush.msrb.mxu3 %v1793_v49 }
 0x38f   :  { %930 = vmatpush.msrb.mxu3 %v1796_v39  ;;  %v1073_v39 = vld [vmem:[%s1966_s0 + $0x78] sm:$0xff] }
 0x391   :  { %931 = vmatpush.msrb.mxu3 %v1799_v59 }
 0x393   :  { %932 = vmatpush.msrb.mxu3 %v1802_v0 }
 0x395   :  { %933 = vmatpush.msrb.mxu3 %v1805_v3 }
 0x397   :  { %934 = vmatpush.msrb.mxu3 %v1808_v6 }
 0x399   :  { %935 = vmatpush.msrb.mxu3 %v1811_v9 }
 0x39b   :  { %936 = vmatpush.msrb.mxu3 %v1814_v12 }
 0x39d   :  { %937 = vmatpush.msrb.mxu3 %v1817_v15 }
 0x39f   :  { %938 = vmatpush.msrb.mxu3 %v1820_v18 }
 0x3a1   :  { %939 = vmatpush.msrb.mxu3 %v1823_v21 }
 0x3a3   :  { %940 = vmatpush.msrb.mxu3 %v1826_v24 }
 0x3a5   :  { %941 = vmatpush.msrb.mxu3 %v1829_v27 }
 0x3a7   :  { %942 = vmatpush.msrb.mxu3 %v1832_v30 }
 0x405   :  { %v700_v48 = vpop.f32.mrf.mxu0 }
 0x406   :  { %v743_v43 = vadd.f32 %v1074_v55, %v700_v48  ;;  %v720_v34 = vpop.f32.mrf.mxu1 }
 0x407   :  { %v763_v37 = vadd.f32 %v2001_v50, %v720_v34  ;;  %v1015_v34 = vld [vmem:[%s1970_s4 + $0x70] sm:$0xff] }
 0x408   :  { %v1077_v49 = vmul.f32 -1.442695, %v743_v43 }
 0x40a   :  { %1143 = vpow2.f32 %v1077_v49  ;;  %v1887_v49 = vld [vmem:[%s1969_s3] ss:$0 sm:$0xff] }
 0x40b   :  { %v680_v59 = vpop.f32.mrf.mxu3 }
 0x40c   :  { %v723_v0 = vadd.f32 %v1073_v39, %v680_v59 }
 0x40e   :  { %v1076_v3 = vmul.f32 -1.442695, %v723_v0 }
 0x410   :  { %v1144_v6 = vpop.eup %1143  ;;  %1145 = vpow2.f32 %v1076_v3  ;;  %v1080_v3 = vld [vmem:[%s1966_s0 + $0xa0] sm:$0xff] }
 0x411   :  { %v747_v9 = vadd.f32 1.0, %v1144_v6 }
 0x413   :  { %1147 = vrcp.f32 %v747_v9  ;;  %v759_v41 = vand.u32 2147483648, %v747_v9  ;;  %vm753_vm13 = vweird.f32 %v747_v9  ;;  %v757_v42 = vand.u32 2147483647, %v747_v9 }
 0x415   :  { %v760_v51 = vor.u32 1.1754944e-38, %v759_v41  ;;  %vm758_vm15 = vcmp.eq.f32.partialorder %v757_v42, 8.507059e+37  ;;  %v1008_v42 = vld [vmem:[%s1970_s4 + $0x38] sm:$0xff] }
 0x416   :  { %v1146_v12 = vpop.eup %1145 }
 0x417   :  { %v727_v15 = vadd.f32 1.0, %v1146_v12 }
 0x419   :  { %1149 = vrcp.f32 %v727_v15  ;;  %v1148_v18 = vpop.eup %1147  ;;  %v739_v30 = vand.u32 2147483648, %v727_v15  ;;  %v737_v32 = vand.u32 2147483647, %v727_v15  ;;  %vm733_vm9 = vweird.f32 %v727_v15 }
 0x41a   :  { %v749_v21 = vmul.f32 %v1148_v18, %v747_v9  ;;  %vm754_vm12 = vweird.f32 %v1148_v18 }
 0x41b   :  { %v740_v36 = vor.u32 1.1754944e-38, %v739_v30  ;;  %vm738_vm11 = vcmp.eq.f32.partialorder %v737_v32, 8.507059e+37  ;;  %vm755_vm14 = vmor %vm753_vm13, %vm754_vm12 }
 0x41c   :  { %v750_v28 = vsub.f32 1.0, %v749_v21 }
 0x41e   :  { %v751_v33 = vmul.f32 %v1148_v18, %v750_v28 }
 0x41f   :  { %v1150_v24 = vpop.eup %1149 }
 0x420   :  { %v729_v27 = vmul.f32 %v1150_v24, %v727_v15  ;;  %vm734_vm8 = vweird.f32 %v1150_v24  ;;  %v752_v46 = vadd.f32 %v1148_v18, %v751_v33  ;;  %v1016_v33 = vld [vmem:[%s1970_s4 + $0x78] sm:$0xff] }
 0x421   :  { %vm735_vm10 = vmor %vm733_vm9, %vm734_vm8  ;;  %1021 = vmatpush.msra.mxu0 %v1016_v33 }
 0x422   :  { %v730_v29 = vsub.f32 1.0, %v729_v27  ;;  %v756_v57 = vsel %vm755_vm14, %v1148_v18, %v752_v46  ;;  %v1009_v46 = vld [vmem:[%s1970_s4 + $0x40] sm:$0xff] }
 0x423   :  { %v761_v50 = vsel %vm758_vm15, %v760_v51, %v756_v57  ;;  %1022 = vmatpush.msra.mxu0 %v1015_v34  ;;  %v1007_v57 = vld [vmem:[%s1970_s4 + $0x30] sm:$0xff]  ;;  %v1006_v51 = vld [vmem:[%s1970_s4 + $0x28] sm:$0xff] }
 0x424   :  { %v731_v31 = vmul.f32 %v1150_v24, %v730_v29  ;;  %v767_v61 = vsub.f32 1.0, %v761_v50  ;;  %v769_v38 = vmul.f32 %v761_v50, %v1846_v26  ;;  %v1084_v50 = vld [vmem:[%s1966_s0 + $0xb0] sm:$0xff] }
 0x426   :  { %v732_v35 = vadd.f32 %v1150_v24, %v731_v31 }
 0x428   :  { %v736_v40 = vsel %vm735_vm10, %v1150_v24, %v732_v35  ;;  %v1014_v35 = vld [vmem:[%s1970_s4 + $0x68] sm:$0xff] }
 0x429   :  { %v741_v44 = vsel %vm738_vm11, %v740_v36, %v736_v40  ;;  %1023 = vmatpush.msra.mxu0 %v1014_v35  ;;  %v1013_v36 = vld [vmem:[%s1970_s4 + $0x60] sm:$0xff]  ;;  %v1011_v40 = vld [vmem:[%s1970_s4 + $0x50] sm:$0xff] }
 0x42a   :  { %v764_v58 = vmul.f32 %v763_v37, %v741_v44  ;;  %v1012_v37 = vld [vmem:[%s1970_s4 + $0x58] sm:$0xff]  ;;  %v1010_v44 = vld [vmem:[%s1970_s4 + $0x48] sm:$0xff] }
 0x42b   :  { %1024 = vmatpush.msra.mxu0 %v1013_v36 }
 0x42c   :  { %v765_v52 = vadd.f32 %v1075_v45, %v764_v58  ;;  %v1083_v45 = vld [vmem:[%s1966_s0 + $0xa8] sm:$0xff] }
 0x42d   :  { %1025 = vmatpush.msra.mxu0 %v1012_v37 }
 0x42e   :  { %1151 = vtanh.f32 %v765_v52 }
 0x42f   :  { %1026 = vmatpush.msra.mxu0 %v1011_v40 }
 0x431   :  { %1027 = vmatpush.msra.mxu0 %v1010_v44 }
 0x433   :  { %1028 = vmatpush.msra.mxu0 %v1009_v46 }
 0x434   :  { %v1152_v47 = vpop.eup %1151 }
 0x435   :  { %v768_v60 = vmul.f32 %v1152_v47, %v767_v61  ;;  %1029 = vmatpush.msra.mxu0 %v1008_v42  ;;  %v1005_v61 = vld [vmem:[%s1970_s4 + $0x20] sm:$0xff] }
 0x437   :  { %v770_v56 = vadd.f32 %v769_v38, %v768_v60  ;;  %1030 = vmatpush.msra.mxu0 %v1007_v57  ;;  %v1004_v38 = vld [vmem:[%s1970_s4 + $0x18] sm:$0xff] }
 0x439   :  { %791 = vmatmul.f32.vlgmr.msra.gmra.mxu2 %v770_v56  ;;  %811 = vmatmul.f32.vlgmr.msra.gmra.mxu3 %v770_v56 }
 0x43a   :  { %831 = vmatmul.f32.vlgmr.msrb.gmra.mxu0 %v770_v56 }
 0x43b   :  { %1031 = vmatpush.msra.mxu0 %v1006_v51 }
 0x43d   :  { %1032 = vmatpush.msra.mxu0 %v1005_v61 }
 0x43f   :  { %1033 = vmatpush.msra.mxu0 %v1004_v38 }
 0x4b7   :  { %v832_v26 = vpop.f32.mrf.mxu0 }
 0x4b8   :  { %v875_v39 = vadd.f32 %v1887_v49, %v832_v26  ;;  %v1085_v26 = vld [vmem:[%s1966_s0 + $0xb8] sm:$0xff] }
 0x4bc   :  { %v792_v54 = vpop.f32.mrf.mxu2  ;;  %v812_v62 = vpop.f32.mrf.mxu3 }
 0x4bd   :  { %v835_v1 = vadd.f32 %v1078_v63, %v792_v54  ;;  %v855_v2 = vadd.f32 %v1079_v53, %v812_v62  ;;  %v1003_v63 = vld [vmem:[%s1970_s4 + $0x10] sm:$0xff]  ;;  %v1002_v54 = vld [vmem:[%s1970_s4 + $0x8] sm:$0xff] }
 0x4be   :  { %1034 = vmatpush.msra.mxu0 %v1003_v63 }
 0x4bf   :  { %v1081_v4 = vmul.f32 -1.442695, %v835_v1  ;;  %v1082_v5 = vmul.f32 -1.442695, %v855_v2  ;;  %v1001_v1 = vld [vmem:[%s1970_s4] sm:$0xff] }
 0x4c0   :  { %1035 = vmatpush.msra.mxu0 %v1002_v54 }
 0x4c1   :  { %1153 = vpow2.f32 %v1081_v4 }
 0x4c2   :  { %1155 = vpow2.f32 %v1082_v5  ;;  %1036 = vmatpush.msra.mxu0 %v1001_v1 }
 0x4c7   :  { %v1154_v7 = vpop.eup %1153 }
 0x4c8   :  { %v1156_v8 = vpop.eup %1155  ;;  %v839_v10 = vadd.f32 1.0, %v1154_v7 }
 0x4c9   :  { %v859_v11 = vadd.f32 1.0, %v1156_v8 }
 0x4ca   :  { %1157 = vrcp.f32 %v839_v10  ;;  %v851_v20 = vand.u32 2147483648, %v839_v10  ;;  %v849_v25 = vand.u32 2147483647, %v839_v10  ;;  %vm845_vm1 = vweird.f32 %v839_v10 }
 0x4cb   :  { %1159 = vrcp.f32 %v859_v11  ;;  %v871_v9 = vand.u32 2147483648, %v859_v11  ;;  %vm865_vm5 = vweird.f32 %v859_v11  ;;  %v869_v15 = vand.u32 2147483647, %v859_v11 }
 0x4cc   :  { %v852_v43 = vor.u32 1.1754944e-38, %v851_v20  ;;  %vm850_vm3 = vcmp.eq.f32.partialorder %v849_v25, 8.507059e+37 }
 0x4cd   :  { %v872_v24 = vor.u32 1.1754944e-38, %v871_v9  ;;  %vm870_vm7 = vcmp.eq.f32.partialorder %v869_v15, 8.507059e+37 }
 0x4d0   :  { %v1158_v13 = vpop.eup %1157 }
 0x4d1   :  { %v1160_v14 = vpop.eup %1159  ;;  %v841_v16 = vmul.f32 %v1158_v13, %v839_v10  ;;  %vm846_vm0 = vweird.f32 %v1158_v13 }
 0x4d2   :  { %v861_v17 = vmul.f32 %v1160_v14, %v859_v11  ;;  %vm847_vm2 = vmor %vm845_vm1, %vm846_vm0  ;;  %vm866_vm4 = vweird.f32 %v1160_v14 }
 0x4d3   :  { %v842_v19 = vsub.f32 1.0, %v841_v16  ;;  %vm867_vm6 = vmor %vm865_vm5, %vm866_vm4 }
 0x4d4   :  { %v862_v22 = vsub.f32 1.0, %v861_v17 }
 0x4d5   :  { %v843_v23 = vmul.f32 %v1158_v13, %v842_v19 }
 0x4d6   :  { %v863_v55 = vmul.f32 %v1160_v14, %v862_v22 }
 0x4d7   :  { %v844_v48 = vadd.f32 %v1158_v13, %v843_v23 }
 0x4d8   :  { %v864_v6 = vadd.f32 %v1160_v14, %v863_v55 }
 0x4d9   :  { %v848_v59 = vsel %vm847_vm2, %v1158_v13, %v844_v48 }
 0x4da   :  { %v853_v0 = vsel %vm850_vm3, %v852_v43, %v848_v59  ;;  %v868_v21 = vsel %vm867_vm6, %v1160_v14, %v864_v6 }
 0x4db   :  { %v876_v12 = vmul.f32 %v875_v39, %v853_v0  ;;  %v873_v27 = vsel %vm870_vm7, %v872_v24, %v868_v21 }
 0x4dc   :  { %v879_v28 = vsub.f32 1.0, %v873_v27  ;;  %v881_v31 = vmul.f32 %v873_v27, %v770_v56 }
 0x4dd   :  { %v877_v18 = vadd.f32 %v1080_v3, %v876_v12 }
 0x4df   :  { %1161 = vtanh.f32 %v877_v18 }
 0x4e5   :  { %v1162_v29 = vpop.eup %1161 }
 0x4e6   :  { %v880_v30 = vmul.f32 %v1162_v29, %v879_v28  ;;  %v1092_v28 = vld [vmem:[%s1971_s5] ss:$0 sm:$0xff] }
 0x4e8   :  { %v1893_v32 = vadd.f32 %v881_v31, %v880_v30 }
 0x4ea   :  { %903 = vmatmul.f32.vlgmr.msrb.gmra.mxu1 %v1893_v32  ;;  %923 = vmatmul.f32.vlgmr.msrb.gmra.mxu2 %v1893_v32 }
 0x4eb   :  { %943 = vmatmul.f32.vlgmr.msrb.gmra.mxu3 %v1893_v32 }
 0x567   :  { %v904_v41 = vpop.f32.mrf.mxu1 }
 0x568   :  { %v947_v58 = vadd.f32 %v1083_v45, %v904_v41 }
 0x56a   :  { %v1086_v52 = vmul.f32 -1.442695, %v947_v58 }
 0x56c   :  { %1163 = vpow2.f32 %v1086_v52 }
 0x56d   :  { %v924_v47 = vpop.f32.mrf.mxu2 }
 0x56e   :  { %v967_v60 = vadd.f32 %v1084_v50, %v924_v47  ;;  %v944_v16 = vpop.f32.mrf.mxu3 }
 0x56f   :  { %v987_v25 = vadd.f32 %v1887_v49, %v944_v16 }
 0x570   :  { %v1087_v56 = vmul.f32 -1.442695, %v967_v60 }
 0x572   :  { %v1164_v53 = vpop.eup %1163  ;;  %1165 = vpow2.f32 %v1087_v56 }
 0x573   :  { %v951_v62 = vadd.f32 1.0, %v1164_v53 }
 0x575   :  { %1167 = vrcp.f32 %v951_v62  ;;  %v963_v10 = vand.u32 2147483648, %v951_v62  ;;  %v961_v13 = vand.u32 2147483647, %v951_v62  ;;  %vm957_vm9 = vweird.f32 %v951_v62 }
 0x577   :  { %v964_v20 = vor.u32 1.1754944e-38, %v963_v10  ;;  %vm962_vm11 = vcmp.eq.f32.partialorder %v961_v13, 8.507059e+37 }
 0x578   :  { %v1166_v2 = vpop.eup %1165 }
 0x579   :  { %v971_v4 = vadd.f32 1.0, %v1166_v2 }
 0x57b   :  { %v1168_v5 = vpop.eup %1167  ;;  %1169 = vrcp.f32 %v971_v4  ;;  %v983_v43 = vand.u32 2147483648, %v971_v4  ;;  %v981_v59 = vand.u32 2147483647, %v971_v4  ;;  %vm977_vm13 = vweird.f32 %v971_v4 }
 0x57c   :  { %v953_v7 = vmul.f32 %v1168_v5, %v951_v62  ;;  %vm958_vm8 = vweird.f32 %v1168_v5 }
 0x57d   :  { %vm959_vm10 = vmor %vm957_vm9, %vm958_vm8  ;;  %v984_v6 = vor.u32 1.1754944e-38, %v983_v43  ;;  %vm982_vm15 = vcmp.eq.f32.partialorder %v981_v59, 8.507059e+37 }
 0x57e   :  { %v954_v8 = vsub.f32 1.0, %v953_v7 }
 0x580   :  { %v955_v11 = vmul.f32 %v1168_v5, %v954_v8 }
 0x581   :  { %v1170_v14 = vpop.eup %1169 }
 0x582   :  { %v973_v17 = vmul.f32 %v1170_v14, %v971_v4  ;;  %v956_v19 = vadd.f32 %v1168_v5, %v955_v11  ;;  %vm978_vm12 = vweird.f32 %v1170_v14 }
 0x583   :  { %vm979_vm14 = vmor %vm977_vm13, %vm978_vm12 }
 0x584   :  { %v974_v22 = vsub.f32 1.0, %v973_v17  ;;  %v960_v23 = vsel %vm959_vm10, %v1168_v5, %v956_v19 }
 0x585   :  { %v965_v55 = vsel %vm962_vm11, %v964_v20, %v960_v23 }
 0x586   :  { %v975_v48 = vmul.f32 %v1170_v14, %v974_v22  ;;  %v988_v39 = vmul.f32 %v987_v25, %v965_v55 }
 0x588   :  { %v989_v0 = vadd.f32 %v1085_v26, %v988_v39  ;;  %v976_v3 = vadd.f32 %v1170_v14, %v975_v48 }
 0x58a   :  { %1171 = vtanh.f32 %v989_v0  ;;  %v980_v9 = vsel %vm979_vm14, %v1170_v14, %v976_v3 }
 0x58b   :  { %v985_v12 = vsel %vm982_vm15, %v984_v6, %v980_v9 }
 0x58c   :  { %v991_v49 = vsub.f32 1.0, %v985_v12  ;;  %v993_v21 = vmul.f32 %v985_v12, %v1893_v32 }
 0x590   :  { %v1172_v15 = vpop.eup %1171 }
 0x591   :  { %v992_v18 = vmul.f32 %v1172_v15, %v991_v49 }
 0x593   :  { %v994_v24 = vadd.f32 %v993_v21, %v992_v18 }
 0x595   :  { %999 = vst [vmem:[%s1973_s7] sm:$0xff] %v994_v24  ;;  %v1000_v27 = vmax.f32 %v994_v24, 0.0 }
 0x597   :  { %1037 = vmatmul.f32.vlgmr.msra.gmra.mxu0 %v1000_v27 }
 0x614   :  { %v1038_v29 = vpop.f32.mrf.mxu0 }
 0x615   :  { %v1039_v30 = vadd.f32 %v1092_v28, %v1038_v29 }
 0x617   :  { %1041 = vst [vmem:[%s1972_s6] sm:$0xff] %v1039_v30 }
 0x618   :  { %1050 = vsyncpa [#allocation4], 1 }

</bundles_post_ra>
